<compile_context>
chip_gen: v7x
topology: tpu7x:2x2x1
jax: 0.10.0
libtpu: 0.0.40
codegen_flags: <defaults>
</compile_context>

<pallas_src>
import functools

import jax
import jax.numpy as jnp
import numpy as np
from jax import lax
from jax.experimental import pallas as pl
from jax.experimental.pallas import tpu as pltpu


# ----------------------------------------------------------------------------
# Pallas kernel: one time-chunk, both directions interleaved.
# Gate-column order (pre-permuted in the wrapper): [i, f, o, hw, g, hw_in].
# ----------------------------------------------------------------------------
def _bidir_lstm_chunk_kernel(lens_ref, proj_f_ref, proj_b_ref,
                             whh_f_ref, whh_b_ref,
                             y_f_ref, y_b_ref, h_out_ref, c_out_ref,
                             hf_ref, cf_ref, hb_ref, cb_ref):
    """
    lens_ref    : (B, 1)  int32      sequence lengths (resident)
    proj_f/b    : (Tc, B, 6H) bf16   input projections (+bias on chunks 0..4)
    whh_f/b     : (H, 5H) bf16       recurrent weights (resident)
    y_f/b       : (Tc, B, H) bf16    per-timestep outputs
    h_out/c_out : (2, B, H) f32      final states (written at the last chunk)
    hf..cb      : (B, H) f32 VMEM    carried recurrent state (scratch)
    """
    c = pl.program_id(0)
    nc = pl.num_programs(0)
    Tc = proj_f_ref.shape[0]
    H = whh_f_ref.shape[0]
    H4, H5 = 4 * H, 5 * H

    @pl.when(c == 0)
    def _init():
        hf_ref[...] = jnp.zeros_like(hf_ref)
        cf_ref[...] = jnp.zeros_like(cf_ref)
        hb_ref[...] = jnp.zeros_like(hb_ref)
        cb_ref[...] = jnp.zeros_like(cb_ref)

    lengths = lens_ref[...]                      # (B, 1) int32
    whh_f = whh_f_ref[...]                       # (H, 5H) bf16, stays resident
    whh_b = whh_b_ref[...]

    t0_f = c * Tc                                # global time of fwd chunk
    t0_b = (nc - 1 - c) * Tc                     # global time of bwd chunk

    hf, cf = hf_ref[...], cf_ref[...]            # f32 carries
    hb, cb = hb_ref[...], cb_ref[...]

    def cell(pin, pst, c_prev):
        # columns: [i | f | o | hw | g (| hw_in)]
        sig = jax.nn.sigmoid(pin[:, :H4] + pst[:, :H4])     # one EUP pass (B,4H)
        g = jnp.tanh(pin[:, H4:H5] + pst[:, H4:H5])
        i_g, f_g = sig[:, 0:H], sig[:, H:2 * H]
        o_g, hw = sig[:, 2 * H:3 * H], sig[:, 3 * H:H4]
        c_new = i_g * g + f_g * c_prev
        out = o_g * jnp.tanh(c_new)
        out = hw * out + (1.0 - hw) * pin[:, H5:]           # highway connection
        return out, c_new

    # Statically unrolled inner loop (Tc capped <= 16 by the wrapper), so all
    # ref offsets and within-chunk indices are compile-time constants.
    for i in range(Tc):
        tb = Tc - 1 - i                          # backward within-chunk index
        pin_f = proj_f_ref[i].astype(jnp.float32)      # (B, 6H)
        pin_b = proj_b_ref[tb].astype(jnp.float32)

        # Two independent recurrent matmuls back-to-back -> MXU pipelining.
        pst_f = jnp.dot(hf.astype(jnp.bfloat16), whh_f,
                        preferred_element_type=jnp.float32)
        pst_b = jnp.dot(hb.astype(jnp.bfloat16), whh_b,
                        preferred_element_type=jnp.float32)

        out_f, c_new_f = cell(pin_f, pst_f, cf)
        out_b, c_new_b = cell(pin_b, pst_b, cb)

        vf = (t0_f + i) < lengths                # (B, 1) bool
        vb = (t0_b + tb) < lengths

        y_f_ref[i] = jnp.where(vf, out_f, 0.0).astype(y_f_ref.dtype)
        y_b_ref[tb] = jnp.where(vb, out_b, 0.0).astype(y_b_ref.dtype)

        hf = jnp.where(vf, out_f, hf)
        cf = jnp.where(vf, c_new_f, cf)
        hb = jnp.where(vb, out_b, hb)
        cb = jnp.where(vb, c_new_b, cb)

    hf_ref[...] = hf
    cf_ref[...] = cf
    hb_ref[...] = hb
    cb_ref[...] = cb

    @pl.when(c == nc - 1)
    def _finalize():
        h_out_ref[0] = hf
        h_out_ref[1] = hb
        c_out_ref[0] = cf
        c_out_ref[1] = cb


# ----------------------------------------------------------------------------
# VMEM-budget-driven time-chunk selection + scoped-VMEM limit
# ----------------------------------------------------------------------------
def _choose_time_chunk(T, B, H, *, max_tc=16, stream_budget_bytes=16 << 20):
    bf16 = 2
    per_t = 2 * 2 * B * (6 * H + H) * bf16       # proj + y, 2 dirs, double-buffered
    tc = max(1, min(max_tc, stream_budget_bytes // max(per_t, 1), T))
    return int(tc)


def _vmem_limit_bytes(Tc, B, H):
    bf16, f32 = 2, 4
    stream = 2 * 2 * Tc * B * (6 * H + H) * bf16          # dbl-buffered proj + y, 2 dirs
    resident = 2 * 2 * H * 5 * H * bf16                   # W_hh both dirs (dbl-buffered)
    states = (4 + 4) * B * H * f32 + 8 * 128 * 4          # scratch + h/c outs + lens pad
    need = stream + resident + states + (2 << 20)
    return int(min(max(2 * need, 16 << 20), 48 << 20))    # safe on 64 MiB v7x VMEM


def run_bidir_augmented_lstm(proj_f, proj_b, lengths_b1, whh_f, whh_b, *, time_chunk):
    """Fused fwd+bwd AugmentedLstm over the (padded) sequence.

    proj_f/proj_b: (T_pad, B, 6H) bf16, whh_*: (H, 5H) bf16, lengths_b1: (B,1) i32.
    Returns y_f, y_b (T_pad, B, H) bf16 and final h, c (2, B, H) f32.
    """
    T_pad, B, sixH = proj_f.shape
    H = sixH // 6
    Tc = time_chunk
    assert T_pad % Tc == 0
    nc = T_pad // Tc

    return pl.pallas_call(
        _bidir_lstm_chunk_kernel,
        grid=(nc,),
        in_specs=[
            pl.BlockSpec((B, 1), lambda c: (0, 0)),                      # lengths
            pl.BlockSpec((Tc, B, sixH), lambda c: (c, 0, 0)),            # proj fwd
            pl.BlockSpec((Tc, B, sixH), lambda c: (nc - 1 - c, 0, 0)),   # proj bwd
            pl.BlockSpec((H, 5 * H), lambda c: (0, 0)),                  # W_hh fwd
            pl.BlockSpec((H, 5 * H), lambda c: (0, 0)),                  # W_hh bwd
        ],
        out_specs=[
            pl.BlockSpec((Tc, B, H), lambda c: (c, 0, 0)),               # y fwd
            pl.BlockSpec((Tc, B, H), lambda c: (nc - 1 - c, 0, 0)),      # y bwd
            pl.BlockSpec((2, B, H), lambda c: (0, 0, 0)),                # final h
            pl.BlockSpec((2, B, H), lambda c: (0, 0, 0)),                # final c
        ],
        out_shape=[
            jax.ShapeDtypeStruct((T_pad, B, H), proj_f.dtype),
            jax.ShapeDtypeStruct((T_pad, B, H), proj_f.dtype),
            jax.ShapeDtypeStruct((2, B, H), jnp.float32),
            jax.ShapeDtypeStruct((2, B, H), jnp.float32),
        ],
        scratch_shapes=[pltpu.VMEM((B, H), jnp.float32) for _ in range(4)],
        compiler_params=pltpu.CompilerParams(
            dimension_semantics=("arbitrary",),
            vmem_limit_bytes=_vmem_limit_bytes(Tc, B, H)),
    )(lengths_b1, proj_f, proj_b, whh_f, whh_b)


# ----------------------------------------------------------------------------
# Hoisted input projection (bf16 MXU) + gate-column permutation
# ----------------------------------------------------------------------------
_GATE_PERM_5 = (0, 1, 3, 4, 2)        # [i,f,g,o,hw]        -> [i,f,o,hw,g]
_GATE_PERM_6 = (0, 1, 3, 4, 2, 5)     # [i,f,g,o,hw,hw_in]  -> [i,f,o,hw,g,hw_in]


def _reorder_gate_cols(w, H, perm):
    chunks = [w[..., k * H:(k + 1) * H] for k in range(len(perm))]
    return jnp.concatenate([chunks[k] for k in perm], axis=-1)


def _matmul_bf16(x, w):
    return jnp.einsum("tbd,dk->tbk", x.astype(jnp.bfloat16), w.astype(jnp.bfloat16),
                      preferred_element_type=jnp.float32)


# ----------------------------------------------------------------------------
# Stacked bidirectional wrapper
# ----------------------------------------------------------------------------
def stacked_bilstm_forward(x_btd, lengths, layer_params, *, time_chunk=None):
    """x_btd: (B, T, D) batch-first, lengths: (B,) int32.

    Returns output (B, T, 2H) and (h_n, c_n) each (num_layers, B, 2H).
    """
    B, T, _ = x_btd.shape
    H = layer_params[0][0][1].shape[0]            # w_hh is (H, 5H)
    Tc = time_chunk or _choose_time_chunk(T, B, H)
    T_pad = ((T + Tc - 1) // Tc) * Tc             # mask makes padded steps no-ops

    x_tbd = jnp.transpose(x_btd, (1, 0, 2))
    if T_pad != T:
        x_tbd = jnp.pad(x_tbd, ((0, T_pad - T), (0, 0), (0, 0)))
    lengths_b1 = lengths.astype(jnp.int32).reshape(B, 1)

    final_h, final_c = [], []
    y_f = y_b = None
    for li, ((wf_ih, wf_hh, bf), (wb_ih, wb_hh, bb)) in enumerate(layer_params):
        wf_ih_r = _reorder_gate_cols(wf_ih, H, _GATE_PERM_6)
        wb_ih_r = _reorder_gate_cols(wb_ih, H, _GATE_PERM_6)
        whh_f = _reorder_gate_cols(wf_hh, H, _GATE_PERM_5).astype(jnp.bfloat16)
        whh_b = _reorder_gate_cols(wb_hh, H, _GATE_PERM_5).astype(jnp.bfloat16)
        # Fold recurrent bias into gate chunks 0..4; highway input (chunk 5)
        # stays bias-free (use_input_projection_bias=False).
        b6_f = jnp.concatenate(
            [_reorder_gate_cols(bf, H, _GATE_PERM_5), jnp.zeros((1, H), bf.dtype)],
            -1).reshape(1, 1, 6 * H)
        b6_b = jnp.concatenate(
            [_reorder_gate_cols(bb, H, _GATE_PERM_5), jnp.zeros((1, H), bb.dtype)],
            -1).reshape(1, 1, 6 * H)

        if li == 0:
            proj_f = _matmul_bf16(x_tbd, wf_ih_r) + b6_f
            proj_b = _matmul_bf16(x_tbd, wb_ih_r) + b6_b
        else:
            # fwd||bwd feature concat folded into two lane-friendly matmuls —
            # no (T, B, 2H) intermediate in HBM.
            proj_f = (_matmul_bf16(y_f, wf_ih_r[:H]) +
                      _matmul_bf16(y_b, wf_ih_r[H:]) + b6_f)
            proj_b = (_matmul_bf16(y_f, wb_ih_r[:H]) +
                      _matmul_bf16(y_b, wb_ih_r[H:]) + b6_b)
        proj_f = proj_f.astype(jnp.bfloat16)
        proj_b = proj_b.astype(jnp.bfloat16)

        y_f, y_b, h_d, c_d = run_bidir_augmented_lstm(
            proj_f, proj_b, lengths_b1, whh_f, whh_b, time_chunk=Tc)

        final_h.append(jnp.concatenate([h_d[0], h_d[1]], -1))   # (B, 2H) f32
        final_c.append(jnp.concatenate([c_d[0], c_d[1]], -1))

    out = jnp.concatenate([y_f, y_b], -1)[:T]                   # (T, B, 2H)
    out = jnp.transpose(out, (1, 0, 2)).astype(jnp.float32)
    return out, (jnp.stack(final_h, 0), jnp.stack(final_c, 0))


# ----------------------------------------------------------------------------
# Deterministic parameter init (PyTorch Linear default: U(-1/sqrt(in), +))
# ----------------------------------------------------------------------------
def init_params(key, input_size, hidden_size, num_layers):
    params = []
    lstm_input_size = input_size
    for _ in range(num_layers):
        layer = []
        for _direction in range(2):
            key, k1, k2, k3 = jax.random.split(key, 4)
            kin = 1.0 / np.sqrt(lstm_input_size)
            kst = 1.0 / np.sqrt(hidden_size)
            w_ih = jax.random.uniform(k1, (lstm_input_size, 6 * hidden_size),
                                      jnp.float32, -kin, kin)
            w_hh = jax.random.uniform(k2, (hidden_size, 5 * hidden_size),
                                      jnp.float32, -kst, kst)
            b = jax.random.uniform(k3, (1, 5 * hidden_size), jnp.float32, -kst, kst)
            layer.append((w_ih, w_hh, b))
        params.append(tuple(layer))
        lstm_input_size = 2 * hidden_size
    return params


# ----------------------------------------------------------------------------
# Pure-JAX reference (lax.scan, original gate order) for correctness check
# ----------------------------------------------------------------------------
def _ref_dir(x, mask, w_ih, w_hh, b, go_forward):
    T, B, _ = x.shape
    H = w_hh.shape[0]
    idxs = jnp.arange(T) if go_forward else jnp.arange(T - 1, -1, -1)

    def step(carry, t):
        h, c = carry
        xt, mt = x[t], mask[t]
        pi = xt @ w_ih
        ps = h @ w_hh + b[0]
        i_g = jax.nn.sigmoid(pi[:, 0*H:1*H] + ps[:, 0*H:1*H])
        f_g = jax.nn.sigmoid(pi[:, 1*H:2*H] + ps[:, 1*H:2*H])
        g_g = jnp.tanh(pi[:, 2*H:3*H] + ps[:, 2*H:3*H])
        o_g = jax.nn.sigmoid(pi[:, 3*H:4*H] + ps[:, 3*H:4*H])
        c_new = i_g * g_g + f_g * c
        out = o_g * jnp.tanh(c_new)
        hw = jax.nn.sigmoid(pi[:, 4*H:5*H] + ps[:, 4*H:5*H])
        out = hw * out + (1.0 - hw) * pi[:, 5*H:6*H]
        valid = mt > 0
        return ((jnp.where(valid, out, h), jnp.where(valid, c_new, c)),
                jnp.where(valid, out, 0.0))

    zeros = jnp.zeros((B, H), x.dtype)
    (h, c), ys = lax.scan(step, (zeros, zeros), idxs)
    y = jnp.zeros((T, B, H), x.dtype).at[idxs].set(ys)
    return y, h, c


def ref_forward(x_btd, lengths, layer_params):
    B, T, _ = x_btd.shape
    x = jnp.transpose(x_btd, (1, 0, 2))
    mask = (jnp.arange(T)[:, None] < lengths[None, :]).astype(x.dtype)[:, :, None]
    final_h, final_c = [], []
    for (wf_ih, wf_hh, bf), (wb_ih, wb_hh, bb) in layer_params:
        yf, hf, cf = _ref_dir(x, mask, wf_ih, wf_hh, bf, True)
        yb, hb, cb = _ref_dir(x, mask, wb_ih, wb_hh, bb, False)
        x = jnp.concatenate([yf, yb], axis=-1)
        final_h.append(jnp.concatenate([hf, hb], axis=-1))
        final_c.append(jnp.concatenate([cf, cb], axis=-1))
    return (jnp.transpose(x, (1, 0, 2)),
            (jnp.stack(final_h, 0), jnp.stack(final_c, 0)))


if __name__ == "__main__":
    INPUT_SIZE = 16
    HIDDEN_SIZE = 32
    NUM_LAYERS = 2
    B, T = 4, 9                                   # T=9 exercises padding to T_pad=12

    key = jax.random.PRNGKey(0)
    kx, kp = jax.random.split(key)
    x = jax.random.normal(kx, (B, T, INPUT_SIZE), jnp.float32)
    lengths = jnp.array([9, 7, 5, 3], dtype=jnp.int32)   # PackedSequence-style lengths
    params = init_params(kp, INPUT_SIZE, HIDDEN_SIZE, NUM_LAYERS)

    fwd = jax.jit(functools.partial(stacked_bilstm_forward, time_chunk=4))
    out, (h_n, c_n) = fwd(x, lengths, params)
    out, h_n, c_n = jax.block_until_ready((out, h_n, c_n))

    assert out.shape == (B, T, 2 * HIDDEN_SIZE)
    assert h_n.shape == (NUM_LAYERS, B, 2 * HIDDEN_SIZE)
    assert c_n.shape == (NUM_LAYERS, B, 2 * HIDDEN_SIZE)

    # correctness vs pure-JAX f32 reference (kernel streams/computes matmuls in bf16)
    ref_out, (ref_h, ref_c) = ref_forward(x, lengths, params)
    np.testing.assert_allclose(np.asarray(out), np.asarray(ref_out), atol=4e-2, rtol=4e-2)
    np.testing.assert_allclose(np.asarray(h_n), np.asarray(ref_h), atol=4e-2, rtol=4e-2)
    np.testing.assert_allclose(np.asarray(c_n), np.asarray(ref_c), atol=4e-2, rtol=4e-2)

    # TODO(synk): variational recurrent dropout (train mode) not implemented;
    # module is reproduced in eval mode with recurrent_dropout_probability=0.
    print("KERNEL_OK")
</pallas_src>

<mosaic_0001>
module attributes {stable_mosaic.version = 11 : i64} {
  func.func @_bidir_lstm_chunk_kernel(%arg0: i32, %arg1: memref<4x1xi32, #tpu.memory_space<vmem>>, %arg2: memref<4x4x192xbf16, #tpu.memory_space<vmem>>, %arg3: memref<4x4x192xbf16, #tpu.memory_space<vmem>>, %arg4: memref<32x160xbf16, #tpu.memory_space<vmem>>, %arg5: memref<32x160xbf16, #tpu.memory_space<vmem>>, %arg6: memref<4x4x32xbf16, #tpu.memory_space<vmem>>, %arg7: memref<4x4x32xbf16, #tpu.memory_space<vmem>>, %arg8: memref<2x4x32xf32, #tpu.memory_space<vmem>>, %arg9: memref<2x4x32xf32, #tpu.memory_space<vmem>>, %arg10: memref<4x32xf32, #tpu.memory_space<vmem>>, %arg11: memref<4x32xf32, #tpu.memory_space<vmem>>, %arg12: memref<4x32xf32, #tpu.memory_space<vmem>>, %arg13: memref<4x32xf32, #tpu.memory_space<vmem>>) attributes {dimension_semantics = [#tpu.dimension_semantics<arbitrary>], iteration_bounds = array<i64: 3>, scalar_prefetch = 0 : i64, scratch_operands = 4 : i64, tpu.core_type = #tpu.core_type<tc>, window_params = [{pipeline_mode = #tpu.pipeline_mode<synchronous>, transform_indices = @transform_0, window_bounds = array<i64: 4, 1>}, {transform_indices = @transform_1, window_bounds = array<i64: 4, 4, 192>}, {transform_indices = @transform_2, window_bounds = array<i64: 4, 4, 192>}, {pipeline_mode = #tpu.pipeline_mode<synchronous>, transform_indices = @transform_3, window_bounds = array<i64: 32, 160>}, {pipeline_mode = #tpu.pipeline_mode<synchronous>, transform_indices = @transform_4, window_bounds = array<i64: 32, 160>}, {transform_indices = @transform_5, window_bounds = array<i64: 4, 4, 32>}, {transform_indices = @transform_6, window_bounds = array<i64: 4, 4, 32>}, {pipeline_mode = #tpu.pipeline_mode<synchronous>, transform_indices = @transform_7, window_bounds = array<i64: 2, 4, 32>}, {pipeline_mode = #tpu.pipeline_mode<synchronous>, transform_indices = @transform_8, window_bounds = array<i64: 2, 4, 32>}]} {
    %c0_i32 = arith.constant 0 : i32
    %0 = arith.cmpi eq, %arg0, %c0_i32 : i32
    %1 = arith.extui %0 : i1 to i32
    %c0_i32_0 = arith.constant 0 : i32
    %2 = arith.cmpi ne, %1, %c0_i32_0 : i32
    scf.if %2 {
      %cst_107 = arith.constant 0.000000e+00 : f32
      %412 = vector.broadcast %cst_107 : f32 to vector<4x32xf32>
      %c0_108 = arith.constant 0 : index
      %c0_109 = arith.constant 0 : index
      %413 = vector.load %arg10[%c0_108, %c0_109] : memref<4x32xf32, #tpu.memory_space<vmem>>, vector<4x32xf32>
      tpu.vector_store %arg10[%c0_108, %c0_109], %412 {strides = array<i32>} : memref<4x32xf32, #tpu.memory_space<vmem>>, vector<4x32xf32>,
      %cst_110 = arith.constant 0.000000e+00 : f32
      %414 = vector.broadcast %cst_110 : f32 to vector<4x32xf32>
      %c0_111 = arith.constant 0 : index
      %c0_112 = arith.constant 0 : index
      %415 = vector.load %arg11[%c0_111, %c0_112] : memref<4x32xf32, #tpu.memory_space<vmem>>, vector<4x32xf32>
      tpu.vector_store %arg11[%c0_111, %c0_112], %414 {strides = array<i32>} : memref<4x32xf32, #tpu.memory_space<vmem>>, vector<4x32xf32>,
      %cst_113 = arith.constant 0.000000e+00 : f32
      %416 = vector.broadcast %cst_113 : f32 to vector<4x32xf32>
      %c0_114 = arith.constant 0 : index
      %c0_115 = arith.constant 0 : index
      %417 = vector.load %arg12[%c0_114, %c0_115] : memref<4x32xf32, #tpu.memory_space<vmem>>, vector<4x32xf32>
      tpu.vector_store %arg12[%c0_114, %c0_115], %416 {strides = array<i32>} : memref<4x32xf32, #tpu.memory_space<vmem>>, vector<4x32xf32>,
      %cst_116 = arith.constant 0.000000e+00 : f32
      %418 = vector.broadcast %cst_116 : f32 to vector<4x32xf32>
      %c0_117 = arith.constant 0 : index
      %c0_118 = arith.constant 0 : index
      %419 = vector.load %arg13[%c0_117, %c0_118] : memref<4x32xf32, #tpu.memory_space<vmem>>, vector<4x32xf32>
      tpu.vector_store %arg13[%c0_117, %c0_118], %418 {strides = array<i32>} : memref<4x32xf32, #tpu.memory_space<vmem>>, vector<4x32xf32>,
    } else {
    }
    %c0 = arith.constant 0 : index
    %c0_1 = arith.constant 0 : index
    %3 = vector.load %arg1[%c0, %c0_1] : memref<4x1xi32, #tpu.memory_space<vmem>>, vector<4x1xi32>
    %c0_2 = arith.constant 0 : index
    %c0_3 = arith.constant 0 : index
    %4 = vector.load %arg4[%c0_2, %c0_3] : memref<32x160xbf16, #tpu.memory_space<vmem>>, vector<32x160xbf16>
    %c0_4 = arith.constant 0 : index
    %c0_5 = arith.constant 0 : index
    %5 = vector.load %arg5[%c0_4, %c0_5] : memref<32x160xbf16, #tpu.memory_space<vmem>>, vector<32x160xbf16>
    %c4_i32 = arith.constant 4 : i32
    %6 = arith.muli %arg0, %c4_i32 : i32
    %c2_i32 = arith.constant 2 : i32
    %7 = arith.subi %c2_i32, %arg0 : i32
    %c4_i32_6 = arith.constant 4 : i32
    %8 = arith.muli %7, %c4_i32_6 : i32
    %c0_7 = arith.constant 0 : index
    %c0_8 = arith.constant 0 : index
    %9 = vector.load %arg10[%c0_7, %c0_8] : memref<4x32xf32, #tpu.memory_space<vmem>>, vector<4x32xf32>
    %c0_9 = arith.constant 0 : index
    %c0_10 = arith.constant 0 : index
    %10 = vector.load %arg11[%c0_9, %c0_10] : memref<4x32xf32, #tpu.memory_space<vmem>>, vector<4x32xf32>
    %c0_11 = arith.constant 0 : index
    %c0_12 = arith.constant 0 : index
    %11 = vector.load %arg12[%c0_11, %c0_12] : memref<4x32xf32, #tpu.memory_space<vmem>>, vector<4x32xf32>
    %c0_13 = arith.constant 0 : index
    %c0_14 = arith.constant 0 : index
    %12 = vector.load %arg13[%c0_13, %c0_14] : memref<4x32xf32, #tpu.memory_space<vmem>>, vector<4x32xf32>
    %c0_15 = arith.constant 0 : index
    %c0_16 = arith.constant 0 : index
    %c0_17 = arith.constant 0 : index
    %13 = vector.load %arg2[%c0_15, %c0_16, %c0_17] : memref<4x4x192xbf16, #tpu.memory_space<vmem>>, vector<1x4x192xbf16>
    %14 = vector.shape_cast %13 : vector<1x4x192xbf16> to vector<4x192xbf16>
    %15 = arith.extf %14 : vector<4x192xbf16> to vector<4x192xf32>
    %c3 = arith.constant 3 : index
    %c0_18 = arith.constant 0 : index
    %c0_19 = arith.constant 0 : index
    %16 = vector.load %arg3[%c3, %c0_18, %c0_19] : memref<4x4x192xbf16, #tpu.memory_space<vmem>>, vector<1x4x192xbf16>
    %17 = vector.shape_cast %16 : vector<1x4x192xbf16> to vector<4x192xbf16>
    %18 = arith.extf %17 : vector<4x192xbf16> to vector<4x192xf32>
    %19 = arith.truncf %9 : vector<4x32xf32> to vector<4x32xbf16>
    %cst = arith.constant dense<0.000000e+00> : vector<4x160xf32>
    %20 = tpu.matmul %19, %4, %cst {dimension_numbers = #tpu.dot_dimension_numbers<[1], [0], [0], [1], [0, 0, 1, 1], [], []>} : vector<4x32xbf16>, vector<32x160xbf16>, vector<4x160xf32> -> vector<4x160xf32>
    %21 = arith.truncf %11 : vector<4x32xf32> to vector<4x32xbf16>
    %cst_20 = arith.constant dense<0.000000e+00> : vector<4x160xf32>
    %22 = tpu.matmul %21, %5, %cst_20 {dimension_numbers = #tpu.dot_dimension_numbers<[1], [0], [0], [1], [0, 0, 1, 1], [], []>} : vector<4x32xbf16>, vector<32x160xbf16>, vector<4x160xf32> -> vector<4x160xf32>
    %23 = vector.extract_strided_slice %15 {offsets = [0, 0], sizes = [4, 128], strides = [1, 1]} : vector<4x192xf32> to vector<4x128xf32>
    %24 = vector.extract_strided_slice %20 {offsets = [0, 0], sizes = [4, 128], strides = [1, 1]} : vector<4x160xf32> to vector<4x128xf32>
    %25 = arith.addf %23, %24 : vector<4x128xf32>
    %26 = arith.negf %25 : vector<4x128xf32>
    %27 = math.exp %26 : vector<4x128xf32>
    %cst_21 = arith.constant 1.000000e+00 : f32
    %28 = vector.broadcast %cst_21 : f32 to vector<4x128xf32>
    %29 = arith.addf %28, %27 : vector<4x128xf32>
    %30 = arith.divf %28, %29 : vector<4x128xf32>
    %31 = vector.extract_strided_slice %15 {offsets = [0, 128], sizes = [4, 32], strides = [1, 1]} : vector<4x192xf32> to vector<4x32xf32>
    %32 = vector.extract_strided_slice %20 {offsets = [0, 128], sizes = [4, 32], strides = [1, 1]} : vector<4x160xf32> to vector<4x32xf32>
    %33 = arith.addf %31, %32 : vector<4x32xf32>
    %34 = math.tanh %33 : vector<4x32xf32>
    %35 = vector.extract_strided_slice %30 {offsets = [0, 0], sizes = [4, 32], strides = [1, 1]} : vector<4x128xf32> to vector<4x32xf32>
    %36 = vector.extract_strided_slice %30 {offsets = [0, 32], sizes = [4, 32], strides = [1, 1]} : vector<4x128xf32> to vector<4x32xf32>
    %37 = vector.extract_strided_slice %30 {offsets = [0, 64], sizes = [4, 32], strides = [1, 1]} : vector<4x128xf32> to vector<4x32xf32>
    %38 = vector.extract_strided_slice %30 {offsets = [0, 96], sizes = [4, 32], strides = [1, 1]} : vector<4x128xf32> to vector<4x32xf32>
    %39 = arith.mulf %35, %34 : vector<4x32xf32>
    %40 = arith.mulf %36, %10 : vector<4x32xf32>
    %41 = arith.addf %39, %40 : vector<4x32xf32>
    %42 = math.tanh %41 : vector<4x32xf32>
    %43 = arith.mulf %37, %42 : vector<4x32xf32>
    %44 = arith.mulf %38, %43 : vector<4x32xf32>
    %cst_22 = arith.constant 1.000000e+00 : f32
    %45 = vector.broadcast %cst_22 : f32 to vector<4x32xf32>
    %46 = arith.subf %45, %38 : vector<4x32xf32>
    %47 = vector.extract_strided_slice %15 {offsets = [0, 160], sizes = [4, 32], strides = [1, 1]} : vector<4x192xf32> to vector<4x32xf32>
    %48 = arith.mulf %46, %47 : vector<4x32xf32>
    %49 = arith.addf %44, %48 : vector<4x32xf32>
    %50 = vector.extract_strided_slice %18 {offsets = [0, 0], sizes = [4, 128], strides = [1, 1]} : vector<4x192xf32> to vector<4x128xf32>
    %51 = vector.extract_strided_slice %22 {offsets = [0, 0], sizes = [4, 128], strides = [1, 1]} : vector<4x160xf32> to vector<4x128xf32>
    %52 = arith.addf %50, %51 : vector<4x128xf32>
    %53 = arith.negf %52 : vector<4x128xf32>
    %54 = math.exp %53 : vector<4x128xf32>
    %cst_23 = arith.constant 1.000000e+00 : f32
    %55 = vector.broadcast %cst_23 : f32 to vector<4x128xf32>
    %56 = arith.addf %55, %54 : vector<4x128xf32>
    %57 = arith.divf %55, %56 : vector<4x128xf32>
    %58 = vector.extract_strided_slice %18 {offsets = [0, 128], sizes = [4, 32], strides = [1, 1]} : vector<4x192xf32> to vector<4x32xf32>
    %59 = vector.extract_strided_slice %22 {offsets = [0, 128], sizes = [4, 32], strides = [1, 1]} : vector<4x160xf32> to vector<4x32xf32>
    %60 = arith.addf %58, %59 : vector<4x32xf32>
    %61 = math.tanh %60 : vector<4x32xf32>
    %62 = vector.extract_strided_slice %57 {offsets = [0, 0], sizes = [4, 32], strides = [1, 1]} : vector<4x128xf32> to vector<4x32xf32>
    %63 = vector.extract_strided_slice %57 {offsets = [0, 32], sizes = [4, 32], strides = [1, 1]} : vector<4x128xf32> to vector<4x32xf32>
    %64 = vector.extract_strided_slice %57 {offsets = [0, 64], sizes = [4, 32], strides = [1, 1]} : vector<4x128xf32> to vector<4x32xf32>
    %65 = vector.extract_strided_slice %57 {offsets = [0, 96], sizes = [4, 32], strides = [1, 1]} : vector<4x128xf32> to vector<4x32xf32>
    %66 = arith.mulf %62, %61 : vector<4x32xf32>
    %67 = arith.mulf %63, %12 : vector<4x32xf32>
    %68 = arith.addf %66, %67 : vector<4x32xf32>
    %69 = math.tanh %68 : vector<4x32xf32>
    %70 = arith.mulf %64, %69 : vector<4x32xf32>
    %71 = arith.mulf %65, %70 : vector<4x32xf32>
    %cst_24 = arith.constant 1.000000e+00 : f32
    %72 = vector.broadcast %cst_24 : f32 to vector<4x32xf32>
    %73 = arith.subf %72, %65 : vector<4x32xf32>
    %74 = vector.extract_strided_slice %18 {offsets = [0, 160], sizes = [4, 32], strides = [1, 1]} : vector<4x192xf32> to vector<4x32xf32>
    %75 = arith.mulf %73, %74 : vector<4x32xf32>
    %76 = arith.addf %71, %75 : vector<4x32xf32>
    %c0_i32_25 = arith.constant 0 : i32
    %77 = arith.addi %6, %c0_i32_25 : i32
    %78 = vector.broadcast %77 : i32 to vector<4x1xi32>
    %79 = arith.cmpi slt, %78, %3 : vector<4x1xi32>
    %c3_i32 = arith.constant 3 : i32
    %80 = arith.addi %8, %c3_i32 : i32
    %81 = vector.broadcast %80 : i32 to vector<4x1xi32>
    %82 = arith.cmpi slt, %81, %3 : vector<4x1xi32>
    %cst_26 = arith.constant 0.000000e+00 : f32
    %83 = vector.shape_cast %79 : vector<4x1xi1> to vector<4x1xi1>
    %84 = vector.broadcast %83 : vector<4x1xi1> to vector<4x32xi1>
    %85 = vector.broadcast %cst_26 : f32 to vector<4x32xf32>
    %86 = arith.select %84, %49, %85 : vector<4x32xi1>, vector<4x32xf32>
    %87 = arith.truncf %86 : vector<4x32xf32> to vector<4x32xbf16>
    %c0_27 = arith.constant 0 : index
    %c0_28 = arith.constant 0 : index
    %c0_29 = arith.constant 0 : index
    %88 = vector.load %arg6[%c0_27, %c0_28, %c0_29] : memref<4x4x32xbf16, #tpu.memory_space<vmem>>, vector<1x4x32xbf16>
    %89 = vector.shape_cast %88 : vector<1x4x32xbf16> to vector<4x32xbf16>
    %90 = vector.shape_cast %87 : vector<4x32xbf16> to vector<1x4x32xbf16>
    tpu.vector_store %arg6[%c0_27, %c0_28, %c0_29], %90 {strides = array<i32>} : memref<4x4x32xbf16, #tpu.memory_space<vmem>>, vector<1x4x32xbf16>,
    %cst_30 = arith.constant 0.000000e+00 : f32
    %91 = vector.shape_cast %82 : vector<4x1xi1> to vector<4x1xi1>
    %92 = vector.broadcast %91 : vector<4x1xi1> to vector<4x32xi1>
    %93 = vector.broadcast %cst_30 : f32 to vector<4x32xf32>
    %94 = arith.select %92, %76, %93 : vector<4x32xi1>, vector<4x32xf32>
    %95 = arith.truncf %94 : vector<4x32xf32> to vector<4x32xbf16>
    %c3_31 = arith.constant 3 : index
    %c0_32 = arith.constant 0 : index
    %c0_33 = arith.constant 0 : index
    %96 = vector.load %arg7[%c3_31, %c0_32, %c0_33] : memref<4x4x32xbf16, #tpu.memory_space<vmem>>, vector<1x4x32xbf16>
    %97 = vector.shape_cast %96 : vector<1x4x32xbf16> to vector<4x32xbf16>
    %98 = vector.shape_cast %95 : vector<4x32xbf16> to vector<1x4x32xbf16>
    tpu.vector_store %arg7[%c3_31, %c0_32, %c0_33], %98 {strides = array<i32>} : memref<4x4x32xbf16, #tpu.memory_space<vmem>>, vector<1x4x32xbf16>,
    %99 = vector.shape_cast %79 : vector<4x1xi1> to vector<4x1xi1>
    %100 = vector.broadcast %99 : vector<4x1xi1> to vector<4x32xi1>
    %101 = arith.select %100, %49, %9 : vector<4x32xi1>, vector<4x32xf32>
    %102 = vector.shape_cast %79 : vector<4x1xi1> to vector<4x1xi1>
    %103 = vector.broadcast %102 : vector<4x1xi1> to vector<4x32xi1>
    %104 = arith.select %103, %41, %10 : vector<4x32xi1>, vector<4x32xf32>
    %105 = vector.shape_cast %82 : vector<4x1xi1> to vector<4x1xi1>
    %106 = vector.broadcast %105 : vector<4x1xi1> to vector<4x32xi1>
    %107 = arith.select %106, %76, %11 : vector<4x32xi1>, vector<4x32xf32>
    %108 = vector.shape_cast %82 : vector<4x1xi1> to vector<4x1xi1>
    %109 = vector.broadcast %108 : vector<4x1xi1> to vector<4x32xi1>
    %110 = arith.select %109, %68, %12 : vector<4x32xi1>, vector<4x32xf32>
    %c1 = arith.constant 1 : index
    %c0_34 = arith.constant 0 : index
    %c0_35 = arith.constant 0 : index
    %111 = vector.load %arg2[%c1, %c0_34, %c0_35] : memref<4x4x192xbf16, #tpu.memory_space<vmem>>, vector<1x4x192xbf16>
    %112 = vector.shape_cast %111 : vector<1x4x192xbf16> to vector<4x192xbf16>
    %113 = arith.extf %112 : vector<4x192xbf16> to vector<4x192xf32>
    %c2 = arith.constant 2 : index
    %c0_36 = arith.constant 0 : index
    %c0_37 = arith.constant 0 : index
    %114 = vector.load %arg3[%c2, %c0_36, %c0_37] : memref<4x4x192xbf16, #tpu.memory_space<vmem>>, vector<1x4x192xbf16>
    %115 = vector.shape_cast %114 : vector<1x4x192xbf16> to vector<4x192xbf16>
    %116 = arith.extf %115 : vector<4x192xbf16> to vector<4x192xf32>
    %117 = arith.truncf %101 : vector<4x32xf32> to vector<4x32xbf16>
    %cst_38 = arith.constant dense<0.000000e+00> : vector<4x160xf32>
    %118 = tpu.matmul %117, %4, %cst_38 {dimension_numbers = #tpu.dot_dimension_numbers<[1], [0], [0], [1], [0, 0, 1, 1], [], []>} : vector<4x32xbf16>, vector<32x160xbf16>, vector<4x160xf32> -> vector<4x160xf32>
    %119 = arith.truncf %107 : vector<4x32xf32> to vector<4x32xbf16>
    %cst_39 = arith.constant dense<0.000000e+00> : vector<4x160xf32>
    %120 = tpu.matmul %119, %5, %cst_39 {dimension_numbers = #tpu.dot_dimension_numbers<[1], [0], [0], [1], [0, 0, 1, 1], [], []>} : vector<4x32xbf16>, vector<32x160xbf16>, vector<4x160xf32> -> vector<4x160xf32>
    %121 = vector.extract_strided_slice %113 {offsets = [0, 0], sizes = [4, 128], strides = [1, 1]} : vector<4x192xf32> to vector<4x128xf32>
    %122 = vector.extract_strided_slice %118 {offsets = [0, 0], sizes = [4, 128], strides = [1, 1]} : vector<4x160xf32> to vector<4x128xf32>
    %123 = arith.addf %121, %122 : vector<4x128xf32>
    %124 = arith.negf %123 : vector<4x128xf32>
    %125 = math.exp %124 : vector<4x128xf32>
    %cst_40 = arith.constant 1.000000e+00 : f32
    %126 = vector.broadcast %cst_40 : f32 to vector<4x128xf32>
    %127 = arith.addf %126, %125 : vector<4x128xf32>
    %128 = arith.divf %126, %127 : vector<4x128xf32>
    %129 = vector.extract_strided_slice %113 {offsets = [0, 128], sizes = [4, 32], strides = [1, 1]} : vector<4x192xf32> to vector<4x32xf32>
    %130 = vector.extract_strided_slice %118 {offsets = [0, 128], sizes = [4, 32], strides = [1, 1]} : vector<4x160xf32> to vector<4x32xf32>
    %131 = arith.addf %129, %130 : vector<4x32xf32>
    %132 = math.tanh %131 : vector<4x32xf32>
    %133 = vector.extract_strided_slice %128 {offsets = [0, 0], sizes = [4, 32], strides = [1, 1]} : vector<4x128xf32> to vector<4x32xf32>
    %134 = vector.extract_strided_slice %128 {offsets = [0, 32], sizes = [4, 32], strides = [1, 1]} : vector<4x128xf32> to vector<4x32xf32>
    %135 = vector.extract_strided_slice %128 {offsets = [0, 64], sizes = [4, 32], strides = [1, 1]} : vector<4x128xf32> to vector<4x32xf32>
    %136 = vector.extract_strided_slice %128 {offsets = [0, 96], sizes = [4, 32], strides = [1, 1]} : vector<4x128xf32> to vector<4x32xf32>
    %137 = arith.mulf %133, %132 : vector<4x32xf32>
    %138 = arith.mulf %134, %104 : vector<4x32xf32>
    %139 = arith.addf %137, %138 : vector<4x32xf32>
    %140 = math.tanh %139 : vector<4x32xf32>
    %141 = arith.mulf %135, %140 : vector<4x32xf32>
    %142 = arith.mulf %136, %141 : vector<4x32xf32>
    %cst_41 = arith.constant 1.000000e+00 : f32
    %143 = vector.broadcast %cst_41 : f32 to vector<4x32xf32>
    %144 = arith.subf %143, %136 : vector<4x32xf32>
    %145 = vector.extract_strided_slice %113 {offsets = [0, 160], sizes = [4, 32], strides = [1, 1]} : vector<4x192xf32> to vector<4x32xf32>
    %146 = arith.mulf %144, %145 : vector<4x32xf32>
    %147 = arith.addf %142, %146 : vector<4x32xf32>
    %148 = vector.extract_strided_slice %116 {offsets = [0, 0], sizes = [4, 128], strides = [1, 1]} : vector<4x192xf32> to vector<4x128xf32>
    %149 = vector.extract_strided_slice %120 {offsets = [0, 0], sizes = [4, 128], strides = [1, 1]} : vector<4x160xf32> to vector<4x128xf32>
    %150 = arith.addf %148, %149 : vector<4x128xf32>
    %151 = arith.negf %150 : vector<4x128xf32>
    %152 = math.exp %151 : vector<4x128xf32>
    %cst_42 = arith.constant 1.000000e+00 : f32
    %153 = vector.broadcast %cst_42 : f32 to vector<4x128xf32>
    %154 = arith.addf %153, %152 : vector<4x128xf32>
    %155 = arith.divf %153, %154 : vector<4x128xf32>
    %156 = vector.extract_strided_slice %116 {offsets = [0, 128], sizes = [4, 32], strides = [1, 1]} : vector<4x192xf32> to vector<4x32xf32>
    %157 = vector.extract_strided_slice %120 {offsets = [0, 128], sizes = [4, 32], strides = [1, 1]} : vector<4x160xf32> to vector<4x32xf32>
    %158 = arith.addf %156, %157 : vector<4x32xf32>
    %159 = math.tanh %158 : vector<4x32xf32>
    %160 = vector.extract_strided_slice %155 {offsets = [0, 0], sizes = [4, 32], strides = [1, 1]} : vector<4x128xf32> to vector<4x32xf32>
    %161 = vector.extract_strided_slice %155 {offsets = [0, 32], sizes = [4, 32], strides = [1, 1]} : vector<4x128xf32> to vector<4x32xf32>
    %162 = vector.extract_strided_slice %155 {offsets = [0, 64], sizes = [4, 32], strides = [1, 1]} : vector<4x128xf32> to vector<4x32xf32>
    %163 = vector.extract_strided_slice %155 {offsets = [0, 96], sizes = [4, 32], strides = [1, 1]} : vector<4x128xf32> to vector<4x32xf32>
    %164 = arith.mulf %160, %159 : vector<4x32xf32>
    %165 = arith.mulf %161, %110 : vector<4x32xf32>
    %166 = arith.addf %164, %165 : vector<4x32xf32>
    %167 = math.tanh %166 : vector<4x32xf32>
    %168 = arith.mulf %162, %167 : vector<4x32xf32>
    %169 = arith.mulf %163, %168 : vector<4x32xf32>
    %cst_43 = arith.constant 1.000000e+00 : f32
    %170 = vector.broadcast %cst_43 : f32 to vector<4x32xf32>
    %171 = arith.subf %170, %163 : vector<4x32xf32>
    %172 = vector.extract_strided_slice %116 {offsets = [0, 160], sizes = [4, 32], strides = [1, 1]} : vector<4x192xf32> to vector<4x32xf32>
    %173 = arith.mulf %171, %172 : vector<4x32xf32>
    %174 = arith.addf %169, %173 : vector<4x32xf32>
    %c1_i32 = arith.constant 1 : i32
    %175 = arith.addi %6, %c1_i32 : i32
    %176 = vector.broadcast %175 : i32 to vector<4x1xi32>
    %177 = arith.cmpi slt, %176, %3 : vector<4x1xi32>
    %c2_i32_44 = arith.constant 2 : i32
    %178 = arith.addi %8, %c2_i32_44 : i32
    %179 = vector.broadcast %178 : i32 to vector<4x1xi32>
    %180 = arith.cmpi slt, %179, %3 : vector<4x1xi32>
    %cst_45 = arith.constant 0.000000e+00 : f32
    %181 = vector.shape_cast %177 : vector<4x1xi1> to vector<4x1xi1>
    %182 = vector.broadcast %181 : vector<4x1xi1> to vector<4x32xi1>
    %183 = vector.broadcast %cst_45 : f32 to vector<4x32xf32>
    %184 = arith.select %182, %147, %183 : vector<4x32xi1>, vector<4x32xf32>
    %185 = arith.truncf %184 : vector<4x32xf32> to vector<4x32xbf16>
    %c1_46 = arith.constant 1 : index
    %c0_47 = arith.constant 0 : index
    %c0_48 = arith.constant 0 : index
    %186 = vector.load %arg6[%c1_46, %c0_47, %c0_48] : memref<4x4x32xbf16, #tpu.memory_space<vmem>>, vector<1x4x32xbf16>
    %187 = vector.shape_cast %186 : vector<1x4x32xbf16> to vector<4x32xbf16>
    %188 = vector.shape_cast %185 : vector<4x32xbf16> to vector<1x4x32xbf16>
    tpu.vector_store %arg6[%c1_46, %c0_47, %c0_48], %188 {strides = array<i32>} : memref<4x4x32xbf16, #tpu.memory_space<vmem>>, vector<1x4x32xbf16>,
    %cst_49 = arith.constant 0.000000e+00 : f32
    %189 = vector.shape_cast %180 : vector<4x1xi1> to vector<4x1xi1>
    %190 = vector.broadcast %189 : vector<4x1xi1> to vector<4x32xi1>
    %191 = vector.broadcast %cst_49 : f32 to vector<4x32xf32>
    %192 = arith.select %190, %174, %191 : vector<4x32xi1>, vector<4x32xf32>
    %193 = arith.truncf %192 : vector<4x32xf32> to vector<4x32xbf16>
    %c2_50 = arith.constant 2 : index
    %c0_51 = arith.constant 0 : index
    %c0_52 = arith.constant 0 : index
    %194 = vector.load %arg7[%c2_50, %c0_51, %c0_52] : memref<4x4x32xbf16, #tpu.memory_space<vmem>>, vector<1x4x32xbf16>
    %195 = vector.shape_cast %194 : vector<1x4x32xbf16> to vector<4x32xbf16>
    %196 = vector.shape_cast %193 : vector<4x32xbf16> to vector<1x4x32xbf16>
    tpu.vector_store %arg7[%c2_50, %c0_51, %c0_52], %196 {strides = array<i32>} : memref<4x4x32xbf16, #tpu.memory_space<vmem>>, vector<1x4x32xbf16>,
    %197 = vector.shape_cast %177 : vector<4x1xi1> to vector<4x1xi1>
    %198 = vector.broadcast %197 : vector<4x1xi1> to vector<4x32xi1>
    %199 = arith.select %198, %147, %101 : vector<4x32xi1>, vector<4x32xf32>
    %200 = vector.shape_cast %177 : vector<4x1xi1> to vector<4x1xi1>
    %201 = vector.broadcast %200 : vector<4x1xi1> to vector<4x32xi1>
    %202 = arith.select %201, %139, %104 : vector<4x32xi1>, vector<4x32xf32>
    %203 = vector.shape_cast %180 : vector<4x1xi1> to vector<4x1xi1>
    %204 = vector.broadcast %203 : vector<4x1xi1> to vector<4x32xi1>
    %205 = arith.select %204, %174, %107 : vector<4x32xi1>, vector<4x32xf32>
    %206 = vector.shape_cast %180 : vector<4x1xi1> to vector<4x1xi1>
    %207 = vector.broadcast %206 : vector<4x1xi1> to vector<4x32xi1>
    %208 = arith.select %207, %166, %110 : vector<4x32xi1>, vector<4x32xf32>
    %c2_53 = arith.constant 2 : index
    %c0_54 = arith.constant 0 : index
    %c0_55 = arith.constant 0 : index
    %209 = vector.load %arg2[%c2_53, %c0_54, %c0_55] : memref<4x4x192xbf16, #tpu.memory_space<vmem>>, vector<1x4x192xbf16>
    %210 = vector.shape_cast %209 : vector<1x4x192xbf16> to vector<4x192xbf16>
    %211 = arith.extf %210 : vector<4x192xbf16> to vector<4x192xf32>
    %c1_56 = arith.constant 1 : index
    %c0_57 = arith.constant 0 : index
    %c0_58 = arith.constant 0 : index
    %212 = vector.load %arg3[%c1_56, %c0_57, %c0_58] : memref<4x4x192xbf16, #tpu.memory_space<vmem>>, vector<1x4x192xbf16>
    %213 = vector.shape_cast %212 : vector<1x4x192xbf16> to vector<4x192xbf16>
    %214 = arith.extf %213 : vector<4x192xbf16> to vector<4x192xf32>
    %215 = arith.truncf %199 : vector<4x32xf32> to vector<4x32xbf16>
    %cst_59 = arith.constant dense<0.000000e+00> : vector<4x160xf32>
    %216 = tpu.matmul %215, %4, %cst_59 {dimension_numbers = #tpu.dot_dimension_numbers<[1], [0], [0], [1], [0, 0, 1, 1], [], []>} : vector<4x32xbf16>, vector<32x160xbf16>, vector<4x160xf32> -> vector<4x160xf32>
    %217 = arith.truncf %205 : vector<4x32xf32> to vector<4x32xbf16>
    %cst_60 = arith.constant dense<0.000000e+00> : vector<4x160xf32>
    %218 = tpu.matmul %217, %5, %cst_60 {dimension_numbers = #tpu.dot_dimension_numbers<[1], [0], [0], [1], [0, 0, 1, 1], [], []>} : vector<4x32xbf16>, vector<32x160xbf16>, vector<4x160xf32> -> vector<4x160xf32>
    %219 = vector.extract_strided_slice %211 {offsets = [0, 0], sizes = [4, 128], strides = [1, 1]} : vector<4x192xf32> to vector<4x128xf32>
    %220 = vector.extract_strided_slice %216 {offsets = [0, 0], sizes = [4, 128], strides = [1, 1]} : vector<4x160xf32> to vector<4x128xf32>
    %221 = arith.addf %219, %220 : vector<4x128xf32>
    %222 = arith.negf %221 : vector<4x128xf32>
    %223 = math.exp %222 : vector<4x128xf32>
    %cst_61 = arith.constant 1.000000e+00 : f32
    %224 = vector.broadcast %cst_61 : f32 to vector<4x128xf32>
    %225 = arith.addf %224, %223 : vector<4x128xf32>
    %226 = arith.divf %224, %225 : vector<4x128xf32>
    %227 = vector.extract_strided_slice %211 {offsets = [0, 128], sizes = [4, 32], strides = [1, 1]} : vector<4x192xf32> to vector<4x32xf32>
    %228 = vector.extract_strided_slice %216 {offsets = [0, 128], sizes = [4, 32], strides = [1, 1]} : vector<4x160xf32> to vector<4x32xf32>
    %229 = arith.addf %227, %228 : vector<4x32xf32>
    %230 = math.tanh %229 : vector<4x32xf32>
    %231 = vector.extract_strided_slice %226 {offsets = [0, 0], sizes = [4, 32], strides = [1, 1]} : vector<4x128xf32> to vector<4x32xf32>
    %232 = vector.extract_strided_slice %226 {offsets = [0, 32], sizes = [4, 32], strides = [1, 1]} : vector<4x128xf32> to vector<4x32xf32>
    %233 = vector.extract_strided_slice %226 {offsets = [0, 64], sizes = [4, 32], strides = [1, 1]} : vector<4x128xf32> to vector<4x32xf32>
    %234 = vector.extract_strided_slice %226 {offsets = [0, 96], sizes = [4, 32], strides = [1, 1]} : vector<4x128xf32> to vector<4x32xf32>
    %235 = arith.mulf %231, %230 : vector<4x32xf32>
    %236 = arith.mulf %232, %202 : vector<4x32xf32>
    %237 = arith.addf %235, %236 : vector<4x32xf32>
    %238 = math.tanh %237 : vector<4x32xf32>
    %239 = arith.mulf %233, %238 : vector<4x32xf32>
    %240 = arith.mulf %234, %239 : vector<4x32xf32>
    %cst_62 = arith.constant 1.000000e+00 : f32
    %241 = vector.broadcast %cst_62 : f32 to vector<4x32xf32>
    %242 = arith.subf %241, %234 : vector<4x32xf32>
    %243 = vector.extract_strided_slice %211 {offsets = [0, 160], sizes = [4, 32], strides = [1, 1]} : vector<4x192xf32> to vector<4x32xf32>
    %244 = arith.mulf %242, %243 : vector<4x32xf32>
    %245 = arith.addf %240, %244 : vector<4x32xf32>
    %246 = vector.extract_strided_slice %214 {offsets = [0, 0], sizes = [4, 128], strides = [1, 1]} : vector<4x192xf32> to vector<4x128xf32>
    %247 = vector.extract_strided_slice %218 {offsets = [0, 0], sizes = [4, 128], strides = [1, 1]} : vector<4x160xf32> to vector<4x128xf32>
    %248 = arith.addf %246, %247 : vector<4x128xf32>
    %249 = arith.negf %248 : vector<4x128xf32>
    %250 = math.exp %249 : vector<4x128xf32>
    %cst_63 = arith.constant 1.000000e+00 : f32
    %251 = vector.broadcast %cst_63 : f32 to vector<4x128xf32>
    %252 = arith.addf %251, %250 : vector<4x128xf32>
    %253 = arith.divf %251, %252 : vector<4x128xf32>
    %254 = vector.extract_strided_slice %214 {offsets = [0, 128], sizes = [4, 32], strides = [1, 1]} : vector<4x192xf32> to vector<4x32xf32>
    %255 = vector.extract_strided_slice %218 {offsets = [0, 128], sizes = [4, 32], strides = [1, 1]} : vector<4x160xf32> to vector<4x32xf32>
    %256 = arith.addf %254, %255 : vector<4x32xf32>
    %257 = math.tanh %256 : vector<4x32xf32>
    %258 = vector.extract_strided_slice %253 {offsets = [0, 0], sizes = [4, 32], strides = [1, 1]} : vector<4x128xf32> to vector<4x32xf32>
    %259 = vector.extract_strided_slice %253 {offsets = [0, 32], sizes = [4, 32], strides = [1, 1]} : vector<4x128xf32> to vector<4x32xf32>
    %260 = vector.extract_strided_slice %253 {offsets = [0, 64], sizes = [4, 32], strides = [1, 1]} : vector<4x128xf32> to vector<4x32xf32>
    %261 = vector.extract_strided_slice %253 {offsets = [0, 96], sizes = [4, 32], strides = [1, 1]} : vector<4x128xf32> to vector<4x32xf32>
    %262 = arith.mulf %258, %257 : vector<4x32xf32>
    %263 = arith.mulf %259, %208 : vector<4x32xf32>
    %264 = arith.addf %262, %263 : vector<4x32xf32>
    %265 = math.tanh %264 : vector<4x32xf32>
    %266 = arith.mulf %260, %265 : vector<4x32xf32>
    %267 = arith.mulf %261, %266 : vector<4x32xf32>
    %cst_64 = arith.constant 1.000000e+00 : f32
    %268 = vector.broadcast %cst_64 : f32 to vector<4x32xf32>
    %269 = arith.subf %268, %261 : vector<4x32xf32>
    %270 = vector.extract_strided_slice %214 {offsets = [0, 160], sizes = [4, 32], strides = [1, 1]} : vector<4x192xf32> to vector<4x32xf32>
    %271 = arith.mulf %269, %270 : vector<4x32xf32>
    %272 = arith.addf %267, %271 : vector<4x32xf32>
    %c2_i32_65 = arith.constant 2 : i32
    %273 = arith.addi %6, %c2_i32_65 : i32
    %274 = vector.broadcast %273 : i32 to vector<4x1xi32>
    %275 = arith.cmpi slt, %274, %3 : vector<4x1xi32>
    %c1_i32_66 = arith.constant 1 : i32
    %276 = arith.addi %8, %c1_i32_66 : i32
    %277 = vector.broadcast %276 : i32 to vector<4x1xi32>
    %278 = arith.cmpi slt, %277, %3 : vector<4x1xi32>
    %cst_67 = arith.constant 0.000000e+00 : f32
    %279 = vector.shape_cast %275 : vector<4x1xi1> to vector<4x1xi1>
    %280 = vector.broadcast %279 : vector<4x1xi1> to vector<4x32xi1>
    %281 = vector.broadcast %cst_67 : f32 to vector<4x32xf32>
    %282 = arith.select %280, %245, %281 : vector<4x32xi1>, vector<4x32xf32>
    %283 = arith.truncf %282 : vector<4x32xf32> to vector<4x32xbf16>
    %c2_68 = arith.constant 2 : index
    %c0_69 = arith.constant 0 : index
    %c0_70 = arith.constant 0 : index
    %284 = vector.load %arg6[%c2_68, %c0_69, %c0_70] : memref<4x4x32xbf16, #tpu.memory_space<vmem>>, vector<1x4x32xbf16>
    %285 = vector.shape_cast %284 : vector<1x4x32xbf16> to vector<4x32xbf16>
    %286 = vector.shape_cast %283 : vector<4x32xbf16> to vector<1x4x32xbf16>
    tpu.vector_store %arg6[%c2_68, %c0_69, %c0_70], %286 {strides = array<i32>} : memref<4x4x32xbf16, #tpu.memory_space<vmem>>, vector<1x4x32xbf16>,
    %cst_71 = arith.constant 0.000000e+00 : f32
    %287 = vector.shape_cast %278 : vector<4x1xi1> to vector<4x1xi1>
    %288 = vector.broadcast %287 : vector<4x1xi1> to vector<4x32xi1>
    %289 = vector.broadcast %cst_71 : f32 to vector<4x32xf32>
    %290 = arith.select %288, %272, %289 : vector<4x32xi1>, vector<4x32xf32>
    %291 = arith.truncf %290 : vector<4x32xf32> to vector<4x32xbf16>
    %c1_72 = arith.constant 1 : index
    %c0_73 = arith.constant 0 : index
    %c0_74 = arith.constant 0 : index
    %292 = vector.load %arg7[%c1_72, %c0_73, %c0_74] : memref<4x4x32xbf16, #tpu.memory_space<vmem>>, vector<1x4x32xbf16>
    %293 = vector.shape_cast %292 : vector<1x4x32xbf16> to vector<4x32xbf16>
    %294 = vector.shape_cast %291 : vector<4x32xbf16> to vector<1x4x32xbf16>
    tpu.vector_store %arg7[%c1_72, %c0_73, %c0_74], %294 {strides = array<i32>} : memref<4x4x32xbf16, #tpu.memory_space<vmem>>, vector<1x4x32xbf16>,
    %295 = vector.shape_cast %275 : vector<4x1xi1> to vector<4x1xi1>
    %296 = vector.broadcast %295 : vector<4x1xi1> to vector<4x32xi1>
    %297 = arith.select %296, %245, %199 : vector<4x32xi1>, vector<4x32xf32>
    %298 = vector.shape_cast %275 : vector<4x1xi1> to vector<4x1xi1>
    %299 = vector.broadcast %298 : vector<4x1xi1> to vector<4x32xi1>
    %300 = arith.select %299, %237, %202 : vector<4x32xi1>, vector<4x32xf32>
    %301 = vector.shape_cast %278 : vector<4x1xi1> to vector<4x1xi1>
    %302 = vector.broadcast %301 : vector<4x1xi1> to vector<4x32xi1>
    %303 = arith.select %302, %272, %205 : vector<4x32xi1>, vector<4x32xf32>
    %304 = vector.shape_cast %278 : vector<4x1xi1> to vector<4x1xi1>
    %305 = vector.broadcast %304 : vector<4x1xi1> to vector<4x32xi1>
    %306 = arith.select %305, %264, %208 : vector<4x32xi1>, vector<4x32xf32>
    %c3_75 = arith.constant 3 : index
    %c0_76 = arith.constant 0 : index
    %c0_77 = arith.constant 0 : index
    %307 = vector.load %arg2[%c3_75, %c0_76, %c0_77] : memref<4x4x192xbf16, #tpu.memory_space<vmem>>, vector<1x4x192xbf16>
    %308 = vector.shape_cast %307 : vector<1x4x192xbf16> to vector<4x192xbf16>
    %309 = arith.extf %308 : vector<4x192xbf16> to vector<4x192xf32>
    %c0_78 = arith.constant 0 : index
    %c0_79 = arith.constant 0 : index
    %c0_80 = arith.constant 0 : index
    %310 = vector.load %arg3[%c0_78, %c0_79, %c0_80] : memref<4x4x192xbf16, #tpu.memory_space<vmem>>, vector<1x4x192xbf16>
    %311 = vector.shape_cast %310 : vector<1x4x192xbf16> to vector<4x192xbf16>
    %312 = arith.extf %311 : vector<4x192xbf16> to vector<4x192xf32>
    %313 = arith.truncf %297 : vector<4x32xf32> to vector<4x32xbf16>
    %cst_81 = arith.constant dense<0.000000e+00> : vector<4x160xf32>
    %314 = tpu.matmul %313, %4, %cst_81 {dimension_numbers = #tpu.dot_dimension_numbers<[1], [0], [0], [1], [0, 0, 1, 1], [], []>} : vector<4x32xbf16>, vector<32x160xbf16>, vector<4x160xf32> -> vector<4x160xf32>
    %315 = arith.truncf %303 : vector<4x32xf32> to vector<4x32xbf16>
    %cst_82 = arith.constant dense<0.000000e+00> : vector<4x160xf32>
    %316 = tpu.matmul %315, %5, %cst_82 {dimension_numbers = #tpu.dot_dimension_numbers<[1], [0], [0], [1], [0, 0, 1, 1], [], []>} : vector<4x32xbf16>, vector<32x160xbf16>, vector<4x160xf32> -> vector<4x160xf32>
    %317 = vector.extract_strided_slice %309 {offsets = [0, 0], sizes = [4, 128], strides = [1, 1]} : vector<4x192xf32> to vector<4x128xf32>
    %318 = vector.extract_strided_slice %314 {offsets = [0, 0], sizes = [4, 128], strides = [1, 1]} : vector<4x160xf32> to vector<4x128xf32>
    %319 = arith.addf %317, %318 : vector<4x128xf32>
    %320 = arith.negf %319 : vector<4x128xf32>
    %321 = math.exp %320 : vector<4x128xf32>
    %cst_83 = arith.constant 1.000000e+00 : f32
    %322 = vector.broadcast %cst_83 : f32 to vector<4x128xf32>
    %323 = arith.addf %322, %321 : vector<4x128xf32>
    %324 = arith.divf %322, %323 : vector<4x128xf32>
    %325 = vector.extract_strided_slice %309 {offsets = [0, 128], sizes = [4, 32], strides = [1, 1]} : vector<4x192xf32> to vector<4x32xf32>
    %326 = vector.extract_strided_slice %314 {offsets = [0, 128], sizes = [4, 32], strides = [1, 1]} : vector<4x160xf32> to vector<4x32xf32>
    %327 = arith.addf %325, %326 : vector<4x32xf32>
    %328 = math.tanh %327 : vector<4x32xf32>
    %329 = vector.extract_strided_slice %324 {offsets = [0, 0], sizes = [4, 32], strides = [1, 1]} : vector<4x128xf32> to vector<4x32xf32>
    %330 = vector.extract_strided_slice %324 {offsets = [0, 32], sizes = [4, 32], strides = [1, 1]} : vector<4x128xf32> to vector<4x32xf32>
    %331 = vector.extract_strided_slice %324 {offsets = [0, 64], sizes = [4, 32], strides = [1, 1]} : vector<4x128xf32> to vector<4x32xf32>
    %332 = vector.extract_strided_slice %324 {offsets = [0, 96], sizes = [4, 32], strides = [1, 1]} : vector<4x128xf32> to vector<4x32xf32>
    %333 = arith.mulf %329, %328 : vector<4x32xf32>
    %334 = arith.mulf %330, %300 : vector<4x32xf32>
    %335 = arith.addf %333, %334 : vector<4x32xf32>
    %336 = math.tanh %335 : vector<4x32xf32>
    %337 = arith.mulf %331, %336 : vector<4x32xf32>
    %338 = arith.mulf %332, %337 : vector<4x32xf32>
    %cst_84 = arith.constant 1.000000e+00 : f32
    %339 = vector.broadcast %cst_84 : f32 to vector<4x32xf32>
    %340 = arith.subf %339, %332 : vector<4x32xf32>
    %341 = vector.extract_strided_slice %309 {offsets = [0, 160], sizes = [4, 32], strides = [1, 1]} : vector<4x192xf32> to vector<4x32xf32>
    %342 = arith.mulf %340, %341 : vector<4x32xf32>
    %343 = arith.addf %338, %342 : vector<4x32xf32>
    %344 = vector.extract_strided_slice %312 {offsets = [0, 0], sizes = [4, 128], strides = [1, 1]} : vector<4x192xf32> to vector<4x128xf32>
    %345 = vector.extract_strided_slice %316 {offsets = [0, 0], sizes = [4, 128], strides = [1, 1]} : vector<4x160xf32> to vector<4x128xf32>
    %346 = arith.addf %344, %345 : vector<4x128xf32>
    %347 = arith.negf %346 : vector<4x128xf32>
    %348 = math.exp %347 : vector<4x128xf32>
    %cst_85 = arith.constant 1.000000e+00 : f32
    %349 = vector.broadcast %cst_85 : f32 to vector<4x128xf32>
    %350 = arith.addf %349, %348 : vector<4x128xf32>
    %351 = arith.divf %349, %350 : vector<4x128xf32>
    %352 = vector.extract_strided_slice %312 {offsets = [0, 128], sizes = [4, 32], strides = [1, 1]} : vector<4x192xf32> to vector<4x32xf32>
    %353 = vector.extract_strided_slice %316 {offsets = [0, 128], sizes = [4, 32], strides = [1, 1]} : vector<4x160xf32> to vector<4x32xf32>
    %354 = arith.addf %352, %353 : vector<4x32xf32>
    %355 = math.tanh %354 : vector<4x32xf32>
    %356 = vector.extract_strided_slice %351 {offsets = [0, 0], sizes = [4, 32], strides = [1, 1]} : vector<4x128xf32> to vector<4x32xf32>
    %357 = vector.extract_strided_slice %351 {offsets = [0, 32], sizes = [4, 32], strides = [1, 1]} : vector<4x128xf32> to vector<4x32xf32>
    %358 = vector.extract_strided_slice %351 {offsets = [0, 64], sizes = [4, 32], strides = [1, 1]} : vector<4x128xf32> to vector<4x32xf32>
    %359 = vector.extract_strided_slice %351 {offsets = [0, 96], sizes = [4, 32], strides = [1, 1]} : vector<4x128xf32> to vector<4x32xf32>
    %360 = arith.mulf %356, %355 : vector<4x32xf32>
    %361 = arith.mulf %357, %306 : vector<4x32xf32>
    %362 = arith.addf %360, %361 : vector<4x32xf32>
    %363 = math.tanh %362 : vector<4x32xf32>
    %364 = arith.mulf %358, %363 : vector<4x32xf32>
    %365 = arith.mulf %359, %364 : vector<4x32xf32>
    %cst_86 = arith.constant 1.000000e+00 : f32
    %366 = vector.broadcast %cst_86 : f32 to vector<4x32xf32>
    %367 = arith.subf %366, %359 : vector<4x32xf32>
    %368 = vector.extract_strided_slice %312 {offsets = [0, 160], sizes = [4, 32], strides = [1, 1]} : vector<4x192xf32> to vector<4x32xf32>
    %369 = arith.mulf %367, %368 : vector<4x32xf32>
    %370 = arith.addf %365, %369 : vector<4x32xf32>
    %c3_i32_87 = arith.constant 3 : i32
    %371 = arith.addi %6, %c3_i32_87 : i32
    %372 = vector.broadcast %371 : i32 to vector<4x1xi32>
    %373 = arith.cmpi slt, %372, %3 : vector<4x1xi32>
    %c0_i32_88 = arith.constant 0 : i32
    %374 = arith.addi %8, %c0_i32_88 : i32
    %375 = vector.broadcast %374 : i32 to vector<4x1xi32>
    %376 = arith.cmpi slt, %375, %3 : vector<4x1xi32>
    %cst_89 = arith.constant 0.000000e+00 : f32
    %377 = vector.shape_cast %373 : vector<4x1xi1> to vector<4x1xi1>
    %378 = vector.broadcast %377 : vector<4x1xi1> to vector<4x32xi1>
    %379 = vector.broadcast %cst_89 : f32 to vector<4x32xf32>
    %380 = arith.select %378, %343, %379 : vector<4x32xi1>, vector<4x32xf32>
    %381 = arith.truncf %380 : vector<4x32xf32> to vector<4x32xbf16>
    %c3_90 = arith.constant 3 : index
    %c0_91 = arith.constant 0 : index
    %c0_92 = arith.constant 0 : index
    %382 = vector.load %arg6[%c3_90, %c0_91, %c0_92] : memref<4x4x32xbf16, #tpu.memory_space<vmem>>, vector<1x4x32xbf16>
    %383 = vector.shape_cast %382 : vector<1x4x32xbf16> to vector<4x32xbf16>
    %384 = vector.shape_cast %381 : vector<4x32xbf16> to vector<1x4x32xbf16>
    tpu.vector_store %arg6[%c3_90, %c0_91, %c0_92], %384 {strides = array<i32>} : memref<4x4x32xbf16, #tpu.memory_space<vmem>>, vector<1x4x32xbf16>,
    %cst_93 = arith.constant 0.000000e+00 : f32
    %385 = vector.shape_cast %376 : vector<4x1xi1> to vector<4x1xi1>
    %386 = vector.broadcast %385 : vector<4x1xi1> to vector<4x32xi1>
    %387 = vector.broadcast %cst_93 : f32 to vector<4x32xf32>
    %388 = arith.select %386, %370, %387 : vector<4x32xi1>, vector<4x32xf32>
    %389 = arith.truncf %388 : vector<4x32xf32> to vector<4x32xbf16>
    %c0_94 = arith.constant 0 : index
    %c0_95 = arith.constant 0 : index
    %c0_96 = arith.constant 0 : index
    %390 = vector.load %arg7[%c0_94, %c0_95, %c0_96] : memref<4x4x32xbf16, #tpu.memory_space<vmem>>, vector<1x4x32xbf16>
    %391 = vector.shape_cast %390 : vector<1x4x32xbf16> to vector<4x32xbf16>
    %392 = vector.shape_cast %389 : vector<4x32xbf16> to vector<1x4x32xbf16>
    tpu.vector_store %arg7[%c0_94, %c0_95, %c0_96], %392 {strides = array<i32>} : memref<4x4x32xbf16, #tpu.memory_space<vmem>>, vector<1x4x32xbf16>,
    %393 = vector.shape_cast %373 : vector<4x1xi1> to vector<4x1xi1>
    %394 = vector.broadcast %393 : vector<4x1xi1> to vector<4x32xi1>
    %395 = arith.select %394, %343, %297 : vector<4x32xi1>, vector<4x32xf32>
    %396 = vector.shape_cast %373 : vector<4x1xi1> to vector<4x1xi1>
    %397 = vector.broadcast %396 : vector<4x1xi1> to vector<4x32xi1>
    %398 = arith.select %397, %335, %300 : vector<4x32xi1>, vector<4x32xf32>
    %399 = vector.shape_cast %376 : vector<4x1xi1> to vector<4x1xi1>
    %400 = vector.broadcast %399 : vector<4x1xi1> to vector<4x32xi1>
    %401 = arith.select %400, %370, %303 : vector<4x32xi1>, vector<4x32xf32>
    %402 = vector.shape_cast %376 : vector<4x1xi1> to vector<4x1xi1>
    %403 = vector.broadcast %402 : vector<4x1xi1> to vector<4x32xi1>
    %404 = arith.select %403, %362, %306 : vector<4x32xi1>, vector<4x32xf32>
    %c0_97 = arith.constant 0 : index
    %c0_98 = arith.constant 0 : index
    %405 = vector.load %arg10[%c0_97, %c0_98] : memref<4x32xf32, #tpu.memory_space<vmem>>, vector<4x32xf32>
    tpu.vector_store %arg10[%c0_97, %c0_98], %395 {strides = array<i32>} : memref<4x32xf32, #tpu.memory_space<vmem>>, vector<4x32xf32>,
    %c0_99 = arith.constant 0 : index
    %c0_100 = arith.constant 0 : index
    %406 = vector.load %arg11[%c0_99, %c0_100] : memref<4x32xf32, #tpu.memory_space<vmem>>, vector<4x32xf32>
    tpu.vector_store %arg11[%c0_99, %c0_100], %398 {strides = array<i32>} : memref<4x32xf32, #tpu.memory_space<vmem>>, vector<4x32xf32>,
    %c0_101 = arith.constant 0 : index
    %c0_102 = arith.constant 0 : index
    %407 = vector.load %arg12[%c0_101, %c0_102] : memref<4x32xf32, #tpu.memory_space<vmem>>, vector<4x32xf32>
    tpu.vector_store %arg12[%c0_101, %c0_102], %401 {strides = array<i32>} : memref<4x32xf32, #tpu.memory_space<vmem>>, vector<4x32xf32>,
    %c0_103 = arith.constant 0 : index
    %c0_104 = arith.constant 0 : index
    %408 = vector.load %arg13[%c0_103, %c0_104] : memref<4x32xf32, #tpu.memory_space<vmem>>, vector<4x32xf32>
    tpu.vector_store %arg13[%c0_103, %c0_104], %404 {strides = array<i32>} : memref<4x32xf32, #tpu.memory_space<vmem>>, vector<4x32xf32>,
    %c2_i32_105 = arith.constant 2 : i32
    %409 = arith.cmpi eq, %arg0, %c2_i32_105 : i32
    %410 = arith.extui %409 : i1 to i32
    %c0_i32_106 = arith.constant 0 : i32
    %411 = arith.cmpi ne, %410, %c0_i32_106 : i32
    scf.if %411 {
      %c0_107 = arith.constant 0 : index
      %c0_108 = arith.constant 0 : index
      %c0_109 = arith.constant 0 : index
      %412 = vector.load %arg8[%c0_107, %c0_108, %c0_109] : memref<2x4x32xf32, #tpu.memory_space<vmem>>, vector<1x4x32xf32>
      %413 = vector.shape_cast %412 : vector<1x4x32xf32> to vector<4x32xf32>
      %414 = vector.shape_cast %395 : vector<4x32xf32> to vector<1x4x32xf32>
      tpu.vector_store %arg8[%c0_107, %c0_108, %c0_109], %414 {strides = array<i32>} : memref<2x4x32xf32, #tpu.memory_space<vmem>>, vector<1x4x32xf32>,
      %c1_110 = arith.constant 1 : index
      %c0_111 = arith.constant 0 : index
      %c0_112 = arith.constant 0 : index
      %415 = vector.load %arg8[%c1_110, %c0_111, %c0_112] : memref<2x4x32xf32, #tpu.memory_space<vmem>>, vector<1x4x32xf32>
      %416 = vector.shape_cast %415 : vector<1x4x32xf32> to vector<4x32xf32>
      %417 = vector.shape_cast %401 : vector<4x32xf32> to vector<1x4x32xf32>
      tpu.vector_store %arg8[%c1_110, %c0_111, %c0_112], %417 {strides = array<i32>} : memref<2x4x32xf32, #tpu.memory_space<vmem>>, vector<1x4x32xf32>,
      %c0_113 = arith.constant 0 : index
      %c0_114 = arith.constant 0 : index
      %c0_115 = arith.constant 0 : index
      %418 = vector.load %arg9[%c0_113, %c0_114, %c0_115] : memref<2x4x32xf32, #tpu.memory_space<vmem>>, vector<1x4x32xf32>
      %419 = vector.shape_cast %418 : vector<1x4x32xf32> to vector<4x32xf32>
      %420 = vector.shape_cast %398 : vector<4x32xf32> to vector<1x4x32xf32>
      tpu.vector_store %arg9[%c0_113, %c0_114, %c0_115], %420 {strides = array<i32>} : memref<2x4x32xf32, #tpu.memory_space<vmem>>, vector<1x4x32xf32>,
      %c1_116 = arith.constant 1 : index
      %c0_117 = arith.constant 0 : index
      %c0_118 = arith.constant 0 : index
      %421 = vector.load %arg9[%c1_116, %c0_117, %c0_118] : memref<2x4x32xf32, #tpu.memory_space<vmem>>, vector<1x4x32xf32>
      %422 = vector.shape_cast %421 : vector<1x4x32xf32> to vector<4x32xf32>
      %423 = vector.shape_cast %404 : vector<4x32xf32> to vector<1x4x32xf32>
      tpu.vector_store %arg9[%c1_116, %c0_117, %c0_118], %423 {strides = array<i32>} : memref<2x4x32xf32, #tpu.memory_space<vmem>>, vector<1x4x32xf32>,
    } else {
    }
    return
  }
  func.func @transform_0(%arg0: i32) -> (i32, i32) {
    %c0_i32 = arith.constant 0 : i32
    %c0_i32_0 = arith.constant 0 : i32
    %c0_i32_1 = arith.constant 0 : i32
    return %c0_i32, %c0_i32_0 : i32, i32
  }
  func.func @transform_1(%arg0: i32) -> (i32, i32, i32) {
    %c0_i32 = arith.constant 0 : i32
    %c0_i32_0 = arith.constant 0 : i32
    %c0_i32_1 = arith.constant 0 : i32
    return %arg0, %c0_i32, %c0_i32_0 : i32, i32, i32
  }
  func.func @transform_2(%arg0: i32) -> (i32, i32, i32) {
    %c2_i32 = arith.constant 2 : i32
    %0 = arith.subi %c2_i32, %arg0 : i32
    %c0_i32 = arith.constant 0 : i32
    %c0_i32_0 = arith.constant 0 : i32
    %c0_i32_1 = arith.constant 0 : i32
    return %0, %c0_i32, %c0_i32_0 : i32, i32, i32
  }
  func.func @transform_3(%arg0: i32) -> (i32, i32) {
    %c0_i32 = arith.constant 0 : i32
    %c0_i32_0 = arith.constant 0 : i32
    %c0_i32_1 = arith.constant 0 : i32
    return %c0_i32, %c0_i32_0 : i32, i32
  }
  func.func @transform_4(%arg0: i32) -> (i32, i32) {
    %c0_i32 = arith.constant 0 : i32
    %c0_i32_0 = arith.constant 0 : i32
    %c0_i32_1 = arith.constant 0 : i32
    return %c0_i32, %c0_i32_0 : i32, i32
  }
  func.func @transform_5(%arg0: i32) -> (i32, i32, i32) {
    %c0_i32 = arith.constant 0 : i32
    %c0_i32_0 = arith.constant 0 : i32
    %c0_i32_1 = arith.constant 0 : i32
    return %arg0, %c0_i32, %c0_i32_0 : i32, i32, i32
  }
  func.func @transform_6(%arg0: i32) -> (i32, i32, i32) {
    %c2_i32 = arith.constant 2 : i32
    %0 = arith.subi %c2_i32, %arg0 : i32
    %c0_i32 = arith.constant 0 : i32
    %c0_i32_0 = arith.constant 0 : i32
    %c0_i32_1 = arith.constant 0 : i32
    return %0, %c0_i32, %c0_i32_0 : i32, i32, i32
  }
  func.func @transform_7(%arg0: i32) -> (i32, i32, i32) {
    %c0_i32 = arith.constant 0 : i32
    %c0_i32_0 = arith.constant 0 : i32
    %c0_i32_1 = arith.constant 0 : i32
    %c0_i32_2 = arith.constant 0 : i32
    return %c0_i32, %c0_i32_0, %c0_i32_1 : i32, i32, i32
  }
  func.func @transform_8(%arg0: i32) -> (i32, i32, i32) {
    %c0_i32 = arith.constant 0 : i32
    %c0_i32_0 = arith.constant 0 : i32
    %c0_i32_1 = arith.constant 0 : i32
    %c0_i32_2 = arith.constant 0 : i32
    return %c0_i32, %c0_i32_0, %c0_i32_1 : i32, i32, i32
  }
}

</mosaic_0001>

<bundles_post_ra>
// kernel: stacked_bilstm_forward.2
= control target key start
LH: loop header
LB: loop body
LE: loop exit
PB: predicated region body
PF: predicated region fallthrough
CT: control target
= control target key end

     0   :  { %s1646_s27 = smov 0   ;;  %s1990_s0 = inlined_call_operand.vmem [shape: s32[4,1], index: 0, kind: input, shape index: {}]   ;;  %s1991_s1 = inlined_call_operand.vmem [shape: bf16[12,4,192], index: 1, kind: input, shape index: {}]   ;;  %s1992_s2 = inlined_call_operand.vmem [shape: bf16[12,4,192], index: 2, kind: input, shape index: {}]   ;;  %s1993_s3 = inlined_call_operand.vmem [shape: bf16[32,160], index: 3, kind: input, shape index: {}]   ;;  %s1994_s4 = inlined_call_operand.vmem [shape: bf16[32,160], index: 4, kind: input, shape index: {}]   ;;  %s1995_s5 = inlined_call_operand.vmem [shape: bf16[12,4,32], index: 5, kind: output, shape index: {0}]   ;;  %s1996_s6 = inlined_call_operand.vmem [shape: bf16[12,4,32], index: 6, kind: output, shape index: {1}]   ;;  %s1997_s7 = inlined_call_operand.vmem [shape: f32[2,4,32], index: 7, kind: output, shape index: {2}]   ;;  %s1998_s8 = inlined_call_operand.vmem [shape: f32[2,4,32], index: 8, kind: output, shape index: {3}]  }
   0x1 LB: > { %s1652_s28 = sadd.s32 4294967295, %s1594_s27   ;;  %p1420_p0 = scmp.ge.s32.totalorder %s1594_s27, 1  ;;  %s1594_s27 = sphi %s1646_s27, %s19_s27  }
   0x2   : > { %p279_p1 = scmp.lt.s32.totalorder %s1594_s27, 4 }
   0x4   : > { %p280_p2 = pnand %p1420_p0, %p279_p1 }
   0x5   : > { %s1657_s29 = sshll.u32 (!%p280_p2), %s1652_s28, 2  ;;  %s334_s30 = ssub.s32 (!%p280_p2), 2, %s1652_s28 }
   0x6   : > { %283 = sbr.rel (%p280_p2) target bundleno = 2937 (0xb79), region = 40  ;;  %p328_p3 = scmp.lt.s32.totalorder (!%p280_p2), %s1657_s29, 11 }
   0x7   : > { %s1661_s9 = sshll.u32 (!%p280_p2), %s334_s30, 2  ;;  %p1431_p5 = scmp.ne.s32.totalorder (!%p280_p2), %s1652_s28, 0 }
   0x8   : > { %p336_p4 = scmp.lt.s32.totalorder (!%p280_p2), %s1661_s9, 11 }
   0xd   : > { %s329_s10 = scalar_select %p328_p3, %s1657_s29, 11 }
   0xe   : > { %s337_s11 = scalar_select %p336_p4, %s1661_s9, 11 }
   0xf   : > { %s1475_s12 = sshll.u32 %s329_s10, 2  ;;  %s1428_s13 = sshll.u32 %s329_s10, 1  ;;  %vm362_vm0 = vcmask (!%p1431_p5), 257024   ;;  %v1596_v0 = vmov (!%p1431_p5), 0.0  }
  0x10   : > { %s1669_s16 = scalar_lea.vmem %s1991_s1, %s1475_s12  ;;  %s1476_s17 = sshll.u32 %s337_s11, 2  ;;  %363 = vst.msk [vmem:[#allocation2] sm:$0xf] (!%p1431_p5), %vm362_vm0, %v1596_v0  ;;  %364 = vst.msk [vmem:[#allocation3] sm:$0xf] (!%p1431_p5), %vm362_vm0, %v1596_v0 }
  0x11   : > { %s1674_s20 = scalar_lea.vmem %s1992_s2, %s1476_s17  ;;  %s1679_s23 = scalar_lea.vmem %s1995_s5, %s1428_s13  ;;  %365 = vst.msk [vmem:[#allocation4] sm:$0xf] (!%p1431_p5), %vm362_vm0, %v1596_v0  ;;  %366 = vst.msk [vmem:[#allocation5] sm:$0xf] (!%p1431_p5), %vm362_vm0, %v1596_v0 }
  0x12   : > { %s1430_s24 = sshll.u32 %s337_s11, 1  ;;  %361 = sbr.rel (%p1431_p5) target bundleno = 25 (0x19), region = 44 }
  0x13   : > { %s1684_s30 = scalar_lea.vmem %s1996_s6, %s1430_s24 }
  0x19 PF: > { %v1690_v1 = vld [vmem:[%s1993_s3 + $0x4] ss:$8 sps:$4 sm:$0xff]   ;;  %v1597_v3 = vmov 0   ;;  %v1703_v4 = vld [vmem:[%s1993_s3] ss:$8 sps:$4 sm:$0xff]   ;;  %s1598_s11 = smov 32   ;;  %v604_v58 = vstv %s1657_s29 }
  0x1a   : > { %v1695_v2 = vld [vmem:[%s1994_s4 + $0x4] ss:$8 sps:$4 sm:$0xff]   ;;  %445 = vmatprep.mubr.bf16.mxu0 %v1597_v3  ;;  %510 = vmatprep.mubr.bf16.mxu1 %v1597_v3  ;;  %v1708_v5 = vld [vmem:[%s1994_s4] ss:$8 sps:$4 sm:$0xff]   ;;  %v1715_v6 = vld [vmem:[%s1993_s3 + $0x14] ss:$8 sps:$4 sm:$0xff]  }
  0x1b   : > { %413 = vmatprep.subr.bf16.mxu0 %v1690_v1  ;;  %1495 = vset.pattern.permute.xlu1 %v1597_v3  ;;  %v1723_v7 = vld [vmem:[%s1994_s4 + $0x14] ss:$8 sps:$4 sm:$0xff]   ;;  %v1728_v8 = vld [vmem:[%s1993_s3 + $0x10] ss:$8 sps:$4 sm:$0xff]   ;;  %v1736_v10 = vld [vmem:[#allocation2] sm:$0xf] }
  0x1c   : > { %478 = vmatprep.subr.bf16.mxu1 %v1695_v2  ;;  %1496 = vset.pattern.permute.xlu0 %v1597_v3  ;;  %v1734_v9 = vld [vmem:[%s1994_s4 + $0x10] ss:$8 sps:$4 sm:$0xff]   ;;  %v1738_v11 = vld [vmem:[#allocation4] sm:$0xf]  ;;  %v1741_v12 = vld [vmem:[#allocation3] sm:$0xf]  ;;  %v388_v13 = vpack.c.bf16 %v1736_v10, %v1736_v10 }
  0x1d   : > { %414 = vmatpush1.bf16.msra.mxu0 %v1703_v4  ;;  %479 = vmatpush1.bf16.msra.mxu1 %v1708_v5  ;;  %v454_v14 = vpack.c.bf16 %v1738_v11, %v1738_v11  ;;  %vm409_vm1 = vcmask 261120   ;;  %v1751_v15 = vld [vmem:[#allocation5] sm:$0xf]  ;;  %v1770_v16 = vld [vmem:[%s1669_s16] sm:$0xff]   ;;  %s1599_s13 = smov 96   ;;  %s1600_s14 = smov 64  }
  0x1e   : > { %415 = vmatprep.subr.bf16.mxu0 %v1715_v6  ;;  %480 = vmatprep.subr.bf16.mxu1 %v1723_v7  ;;  %v1773_v17 = vld [vmem:[%s1674_s20 + $0x8] sm:$0xff]   ;;  %v384_v18 = vunpack.c.l.bf16 %v1770_v16  ;;  %v1785_v57 = vld [vmem:[%s1990_s0] sm:$0xf]  ;;  %s606_s18 = sadd.s32 3, %s1661_s9  ;;  %vm557_vm4 = vcmask 523264   ;;  %vm620_vm7 = vcmask 254976  }
  0x1f   : > { %533 = vrot.lane.b32.xlu0 %v1741_v12, %s1598_s11  ;;  %v387_v19 = vunpack.c.h.bf16 %v1773_v17  ;;  %vm605_vm2 = vcmp.lt.s32.totalorder %v604_v58, %v1785_v57  ;;  %v607_v61 = vstv %s606_s18  ;;  %s819_s19 = sadd.s32 1, %s1657_s29  ;;  %s822_s21 = sadd.s32 2, %s1661_s9 }
  0x20   : > { %v527_v42 = vrot.slane %v384_v18, 4  ;;  %v609_v63 = vsel %vm605_vm2, 1, %v1597_v3  ;;  %vm608_vm3 = vcmp.lt.s32.totalorder %v607_v61, %v1785_v57  ;;  %s1250_s22 = sadd.s32 3, %s1657_s29  ;;  %vm1284_vm2 = vcmask 257024   ;;  %p1470_p6 = scmp.ne.s32.totalorder %s1652_s28, 2 }
  0x21   : > { %416 = vmatpush1.bf16.msra.mxu0 %v1728_v8  ;;  %481 = vmatpush1.bf16.msra.mxu1 %v1734_v9  ;;  %v570_v44 = vrot.slane %v387_v19, 4  ;;  %v1490_v55 = vpack.i.bf16 %v387_v19, %v384_v18 }
  0x22   : > { %649 = vmatprep.subr.bf16.mxu0 %v1690_v1  ;;  %694 = vmatprep.subr.bf16.mxu1 %v1695_v2 }
  0x23   : > { %576 = vrot.lane.b32.xlu0 %v1751_v15, %s1598_s11 }
  0x24   : > { %1439 = vmatmul.mubr.msk.bf16.vlgmr.msra.gmra.mrb[0].mxu0 %vm409_vm1, %v388_v13  ;;  %1444 = vmatmul.mubr.msk.bf16.vlgmr.msra.gmra.mrb[0].mxu1 %vm409_vm1, %v454_v14  ;;  %v622_v13 = vsel %vm608_vm3, 1, %v1597_v3 }
  0x25   : > { %650 = vmatpush1.bf16.msra.mxu0 %v1703_v4  ;;  %695 = vmatpush1.bf16.msra.mxu1 %v1708_v5 }
  0x26   : > { %651 = vmatprep.subr.bf16.mxu0 %v1715_v6  ;;  %681 = vmatprep.mubr.bf16.mxu0 %v1597_v3 }
  0x27   : > { %696 = vmatprep.subr.bf16.mxu1 %v1723_v7  ;;  %726 = vmatprep.mubr.bf16.mxu1 %v1597_v3 }
  0x29   : > { %652 = vmatpush1.bf16.msra.mxu0 %v1728_v8  ;;  %697 = vmatpush1.bf16.msra.mxu1 %v1734_v9 }
  0x2a   : > { %865 = vmatprep.subr.bf16.mxu0 %v1690_v1  ;;  %910 = vmatprep.subr.bf16.mxu1 %v1695_v2 }
  0x91   : > { %v534_v36 = vpop.permute.xlu0 %533 }
  0x95   : > { %v577_v38 = vpop.permute.xlu0 %576 }
  0xf7   : > { %v447_v20 = vpop.f32.mrb[0].mxu0  ;;  %v512_v21 = vpop.f32.mrb[0].mxu1 }
  0xf8   : > { %v519_v22 = vadd.f32 %v447_v20, %v384_v18  ;;  %v562_v23 = vadd.f32 %v512_v21, %v387_v19  ;;  %v449_v24 = vpop.f32.mrb[1].mxu0  ;;  %v514_v25 = vpop.f32.mrb[1].mxu1 }
  0xf9   : > { %v451_v26 = vpop.f32.mrb[2].mxu0  ;;  %v516_v27 = vpop.f32.mrb[2].mxu1  ;;  %v529_v43 = vadd.f32 %v527_v42, %v449_v24  ;;  %v572_v45 = vadd.f32 %v570_v44, %v514_v25 }
  0xfa   : > { %v1445_v28 = vmul.f32 -1.442695, %v519_v22  ;;  %v1446_v29 = vmul.f32 -1.442695, %v562_v23  ;;  %v452_v30 = vpop.f32.mrb[3].mxu0  ;;  %v517_v31 = vpop.f32.mrb[3].mxu1 }
  0xfc   : > { %1524 = vpow2.f32 %v1445_v28 }
  0xfd   : > { %1526 = vpow2.f32 %v1446_v29 }
 0x106   : > { %v1525_v32 = vpop.eup %1524 }
 0x107   : > { %v1527_v33 = vpop.eup %1526  ;;  %v523_v34 = vadd.f32 1.0, %v1525_v32 }
 0x108   : > { %v566_v35 = vadd.f32 1.0, %v1527_v33 }
 0x109   : > { %1528 = vrcp.f32 %v523_v34 }
 0x10a   : > { %1530 = vrcp.f32 %v566_v35 }
 0x10b   : > { %1532 = vtanh.f32 %v529_v43 }
 0x10c   : > { %1534 = vtanh.f32 %v572_v45 }
 0x113   : > { %v1529_v37 = vpop.eup %1528 }
 0x114   : > { %v536_v39 = vmul.f32 %v1529_v37, %v534_v36  ;;  %v1531_v40 = vpop.eup %1530  ;;  %v553_v23 = vsub.f32 1.0, %v1529_v37 }
 0x115   : > { %v579_v41 = vmul.f32 %v1531_v40, %v577_v38  ;;  %v1533_v46 = vpop.eup %1532  ;;  %v596_v29 = vsub.f32 1.0, %v1531_v40 }
 0x116   : > { %538 = vrot.lane.b32.xlu1 %v536_v39, %s1599_s13  ;;  %v531_v47 = vmul.f32 %v1533_v46, %v1529_v37  ;;  %v1535_v50 = vpop.eup %1534 }
 0x117   : > { %v574_v51 = vmul.f32 %v1535_v50, %v1531_v40 }
 0x11a   : > { %581 = vrot.lane.b32.xlu1 %v579_v41, %s1599_s13 }
 0x188   : > { %v539_v48 = vpop.permute.xlu1 %538 }
 0x189   : > { %v541_v49 = vadd.f32 %v539_v48, %v531_v47  ;;  %v644_v48 = vunpack.c.l.bf16 %v1773_v17 }
 0x18b   : > { %1536 = vtanh.f32 %v541_v49 }
 0x18c   : > { %v582_v52 = vpop.permute.xlu1 %581 }
 0x18d   : > { %v584_v53 = vadd.f32 %v582_v52, %v574_v51 }
 0x18f   : > { %1538 = vtanh.f32 %v584_v53 }
 0x195   : > { %v1537_v54 = vpop.eup %1536 }
 0x196   : > { %544 = vrot.lane.b32.xlu0 %v1537_v54, %s1600_s14 }
 0x199   : > { %v1539_v56 = vpop.eup %1538 }
 0x19a   : > { %587 = vrot.lane.b32.xlu1 %v1539_v56, %s1600_s14  ;;  %1491 = vrot.lane.b32.xlu0 %v1490_v55, %s1600_s14 }
 0x208   : > { %v545_v59 = vpop.permute.xlu0 %544 }
 0x209   : > { %v547_v60 = vmul.f32 %v1529_v37, %v545_v59 }
 0x20b   : > { %549 = vrot.lane.b32.xlu1 %v547_v60, %s1598_s11 }
 0x20c   : > { %v588_v62 = vpop.permute.xlu1 %587  ;;  %v1492_v14 = vpop.permute.xlu0 %1491 }
 0x20d   : > { %v590_v0 = vmul.f32 %v1531_v40, %v588_v62  ;;  %v1493_v18 = vunpack.i.l.bf16 %v1492_v14  ;;  %v1494_v19 = vunpack.i.h.bf16 %v1492_v14 }
 0x20f   : > { %592 = vrot.lane.b32.xlu0 %v590_v0, %s1598_s11  ;;  %611 = vperm.xlu1 %1495, %v609_v63   ;;  %v556_v20 = vrot.slane %v1493_v18, 4  ;;  %v599_v21 = vrot.slane %v1494_v19, 4 }
 0x211   : > { %v558_v22 = vsel %vm557_vm4, %v1493_v18, %v556_v20  ;;  %v600_v27 = vsel %vm557_vm4, %v1494_v19, %v599_v21  ;;  %v785_v18 = vrot.slane %v644_v48, 4 }
 0x212   : > { %v560_v26 = vmul.f32 %v558_v22, %v553_v23  ;;  %v602_v32 = vmul.f32 %v600_v27, %v596_v29 }
 0x213   : > { %624 = vperm.xlu0 %1496, %v622_v13  }
 0x27d   : > { %v550_v24 = vpop.permute.xlu1 %549 }
 0x27e   : > { %v552_v25 = vmul.f32 %v1529_v37, %v550_v24 }
 0x280   : > { %v561_v28 = vadd.f32 %v560_v26, %v552_v25 }
 0x281   : > { %v593_v30 = vpop.permute.xlu0 %592 }
 0x282   : > { %v595_v31 = vmul.f32 %v1531_v40, %v593_v30  ;;  %615 = vrot.lane.b32.xlu1 %v561_v28, %s1598_s11 }
 0x284   : > { %v603_v33 = vadd.f32 %v602_v32, %v595_v31  ;;  %v820_v31 = vstv %s819_s19 }
 0x285   : > { %vm821_vm8 = vcmp.lt.s32.totalorder %v820_v31, %v1785_v57 }
 0x286   : > { %628 = vrot.lane.b32.xlu1 %v603_v33, %s1598_s11 }
 0x28e   : > { %v612_v34 = vpop.permute.xlu1 %611 }
 0x28f   : > { %vm613_vm5 = vcmp.eq.s32.totalorder %v612_v34, 1  ;;  %v823_v34 = vstv %s822_s21 }
 0x290   : > { %v1800_v35 = vsel %vm613_vm5, %v541_v49, %v1741_v12  ;;  %vm824_vm9 = vcmp.lt.s32.totalorder %v823_v34, %v1785_v57 }
 0x291   : > { %749 = vrot.lane.b32.xlu0 %v1800_v35, %s1598_s11 }
 0x292   : > { %v625_v36 = vpop.permute.xlu0 %624 }
 0x293   : > { %vm626_vm6 = vcmp.eq.s32.totalorder %v625_v36, 1 }
 0x294   : > { %v1805_v37 = vsel %vm626_vm6, %v584_v53, %v1751_v15 }
 0x295   : > { %791 = vrot.lane.b32.xlu1 %v1805_v37, %s1598_s11 }
 0x2f4   : > { %v616_v38 = vpop.permute.xlu1 %615 }
 0x2f5   : > { %v618_v39 = vsel %vm613_vm5, %v616_v38, 0.0  ;;  %v1810_v40 = vsel %vm613_vm5, %v616_v38, %v1736_v10  ;;  %v825_v38 = vsel %vm821_vm8, 1, %v1597_v3 }
 0x2f6   : > { %v619_v12 = vpack.c.bf16 %v618_v39, %v618_v39  ;;  %v645_v41 = vpack.c.bf16 %v1810_v40, %v1810_v40 }
 0x2f8   : > { %621 = vst.msk [vmem:[%s1679_s23] sm:$0x3] %vm620_vm7, %v619_v12  ;;  %1450 = vmatmul.mubr.msk.bf16.vlgmr.msra.gmra.mrb[4].mxu0 %vm409_vm1, %v645_v41  ;;  %v629_v15 = vpop.permute.xlu1 %628  ;;  %v838_v12 = vsel %vm824_vm9, 1, %v1597_v3 }
 0x2f9   : > { %v631_v42 = vsel %vm626_vm6, %v629_v15, 0.0  ;;  %v1818_v43 = vsel %vm626_vm6, %v629_v15, %v1738_v11  ;;  %866 = vmatpush1.bf16.msra.mxu0 %v1703_v4  ;;  %897 = vmatprep.mubr.bf16.mxu0 %v1597_v3  ;;  %v641_v11 = vunpack.c.h.bf16 %v1770_v16 }
 0x2fa   : > { %v632_v44 = vpack.c.bf16 %v631_v42, %v631_v42  ;;  %v690_v10 = vpack.c.bf16 %v1818_v43, %v1818_v43  ;;  %867 = vmatprep.subr.bf16.mxu0 %v1715_v6 }
 0x2fb   : > { %v743_v13 = vrot.slane %v641_v11, 4  ;;  %v1497_v29 = vpack.i.bf16 %v644_v48, %v641_v11 }
 0x2fc   : > { %1447 = vst.msk [vmem:[%s1684_s30 + $0x6] sm:$0x3] %vm620_vm7, %v632_v44  ;;  %1451 = vmatmul.mubr.msk.bf16.vlgmr.msra.gmra.mrb[4].mxu1 %vm409_vm1, %v690_v10 }
 0x2fd   : > { %911 = vmatpush1.bf16.msra.mxu1 %v1708_v5  ;;  %868 = vmatpush1.bf16.msra.mxu0 %v1728_v8 }
 0x2fe   : > { %912 = vmatprep.subr.bf16.mxu1 %v1723_v7  ;;  %942 = vmatprep.mubr.bf16.mxu1 %v1597_v3 }
 0x2ff   : > { %1080 = vmatprep.subr.bf16.mxu0 %v1690_v1 }
 0x301   : > { %913 = vmatpush1.bf16.msra.mxu1 %v1734_v9 }
 0x302   : > { %1125 = vmatprep.subr.bf16.mxu1 %v1695_v2 }
 0x303   : > { %v750_v61 = vpop.permute.xlu0 %749 }
 0x307   : > { %v792_v63 = vpop.permute.xlu1 %791 }
 0x3cb   : > { %v683_v45 = vpop.f32.mrb[4].mxu0 }
 0x3cc   : > { %v735_v46 = vadd.f32 %v683_v45, %v641_v11  ;;  %v685_v47 = vpop.f32.mrb[5].mxu0 }
 0x3cd   : > { %v687_v49 = vpop.f32.mrb[6].mxu0  ;;  %v745_v14 = vadd.f32 %v743_v13, %v685_v47 }
 0x3ce   : > { %v1452_v50 = vmul.f32 -1.442695, %v735_v46  ;;  %v688_v51 = vpop.f32.mrb[7].mxu0 }
 0x3cf   : > { %v728_v52 = vpop.f32.mrb[4].mxu1 }
 0x3d0   : > { %1540 = vpow2.f32 %v1452_v50  ;;  %v777_v53 = vadd.f32 %v728_v52, %v644_v48  ;;  %v730_v54 = vpop.f32.mrb[5].mxu1 }
 0x3d1   : > { %v732_v55 = vpop.f32.mrb[6].mxu1  ;;  %v787_v19 = vadd.f32 %v785_v18, %v730_v54 }
 0x3d2   : > { %v1453_v1 = vmul.f32 -1.442695, %v777_v53  ;;  %v733_v56 = vpop.f32.mrb[7].mxu1 }
 0x3d4   : > { %1542 = vpow2.f32 %v1453_v1 }
 0x3da   : > { %v1541_v58 = vpop.eup %1540 }
 0x3db   : > { %v739_v2 = vadd.f32 1.0, %v1541_v58 }
 0x3dd   : > { %1544 = vrcp.f32 %v739_v2 }
 0x3de   : > { %v1543_v16 = vpop.eup %1542 }
 0x3df   : > { %v781_v59 = vadd.f32 1.0, %v1543_v16 }
 0x3e1   : > { %1546 = vrcp.f32 %v781_v59 }
 0x3e2   : > { %1548 = vtanh.f32 %v745_v14 }
 0x3e3   : > { %1550 = vtanh.f32 %v787_v19 }
 0x3e7   : > { %v1545_v60 = vpop.eup %1544 }
 0x3e8   : > { %v752_v17 = vmul.f32 %v1545_v60, %v750_v61  ;;  %v769_v45 = vsub.f32 1.0, %v1545_v60 }
 0x3ea   : > { %754 = vrot.lane.b32.xlu0 %v752_v17, %s1599_s13 }
 0x3eb   : > { %v1547_v62 = vpop.eup %1546 }
 0x3ec   : > { %v794_v0 = vmul.f32 %v1547_v62, %v792_v63  ;;  %v1549_v20 = vpop.eup %1548  ;;  %v811_v51 = vsub.f32 1.0, %v1547_v62 }
 0x3ed   : > { %v747_v21 = vmul.f32 %v1549_v20, %v1545_v60  ;;  %v1551_v24 = vpop.eup %1550 }
 0x3ee   : > { %796 = vrot.lane.b32.xlu1 %v794_v0, %s1599_s13  ;;  %v789_v25 = vmul.f32 %v1551_v24, %v1547_v62  ;;  %v1893_v0 = vld [vmem:[%s1674_s20] sm:$0xff]   ;;  %s1038_s20 = sadd.s32 1, %s1661_s9 }
 0x3ef   : > { %v860_v18 = vunpack.c.h.bf16 %v1893_v0 }
 0x45c   : > { %v755_v22 = vpop.permute.xlu0 %754 }
 0x45d   : > { %v757_v23 = vadd.f32 %v755_v22, %v747_v21 }
 0x45f   : > { %1552 = vtanh.f32 %v757_v23 }
 0x460   : > { %v797_v26 = vpop.permute.xlu1 %796 }
 0x461   : > { %v799_v27 = vadd.f32 %v797_v26, %v789_v25 }
 0x463   : > { %1554 = vtanh.f32 %v799_v27 }
 0x469   : > { %v1553_v28 = vpop.eup %1552 }
 0x46a   : > { %760 = vrot.lane.b32.xlu0 %v1553_v28, %s1600_s14 }
 0x46d   : > { %v1555_v30 = vpop.eup %1554 }
 0x46e   : > { %1498 = vrot.lane.b32.xlu0 %v1497_v29, %s1600_s14  ;;  %802 = vrot.lane.b32.xlu1 %v1555_v30, %s1600_s14 }
 0x4dc   : > { %v761_v32 = vpop.permute.xlu0 %760 }
 0x4dd   : > { %v763_v33 = vmul.f32 %v1545_v60, %v761_v32 }
 0x4df   : > { %765 = vrot.lane.b32.xlu1 %v763_v33, %s1598_s11 }
 0x4e0   : > { %v803_v36 = vpop.permute.xlu1 %802  ;;  %v1499_v41 = vpop.permute.xlu0 %1498 }
 0x4e1   : > { %v805_v39 = vmul.f32 %v1547_v62, %v803_v36  ;;  %v1500_v15 = vunpack.i.l.bf16 %v1499_v41  ;;  %v1501_v42 = vunpack.i.h.bf16 %v1499_v41 }
 0x4e3   : > { %827 = vperm.xlu1 %1495, %v825_v38   ;;  %807 = vrot.lane.b32.xlu0 %v805_v39, %s1598_s11  ;;  %v772_v44 = vrot.slane %v1500_v15, 4  ;;  %v814_v10 = vrot.slane %v1501_v42, 4  ;;  %v1001_v38 = vrot.slane %v860_v18, 4 }
 0x4e5   : > { %v773_v11 = vsel %vm557_vm4, %v1500_v15, %v772_v44  ;;  %v815_v49 = vsel %vm557_vm4, %v1501_v42, %v814_v10 }
 0x4e6   : > { %v775_v47 = vmul.f32 %v773_v11, %v769_v45  ;;  %v817_v53 = vmul.f32 %v815_v49, %v811_v51 }
 0x4e7   : > { %840 = vperm.xlu0 %1496, %v838_v12  }
 0x551   : > { %v766_v46 = vpop.permute.xlu1 %765 }
 0x552   : > { %v768_v48 = vmul.f32 %v1545_v60, %v766_v46 }
 0x554   : > { %v776_v50 = vadd.f32 %v775_v47, %v768_v48 }
 0x555   : > { %v808_v52 = vpop.permute.xlu0 %807 }
 0x556   : > { %v810_v54 = vmul.f32 %v1547_v62, %v808_v52  ;;  %831 = vrot.lane.b32.xlu1 %v776_v50, %s1598_s11  ;;  %v1039_v52 = vstv %s1038_s20 }
 0x557   : > { %vm1040_vm13 = vcmp.lt.s32.totalorder %v1039_v52, %v1785_v57 }
 0x558   : > { %v818_v55 = vadd.f32 %v817_v53, %v810_v54 }
 0x55a   : > { %844 = vrot.lane.b32.xlu0 %v818_v55, %s1598_s11 }
 0x562   : > { %v828_v1 = vpop.permute.xlu1 %827 }
 0x563   : > { %vm829_vm10 = vcmp.eq.s32.totalorder %v828_v1, 1  ;;  %v1054_v1 = vsel %vm1040_vm13, 1, %v1597_v3 }
 0x564   : > { %v1855_v56 = vsel %vm829_vm10, %v757_v23, %v1800_v35 }
 0x565   : > { %965 = vrot.lane.b32.xlu1 %v1855_v56, %s1598_s11 }
 0x566   : > { %v841_v58 = vpop.permute.xlu0 %840 }
 0x567   : > { %vm842_vm11 = vcmp.eq.s32.totalorder %v841_v58, 1 }
 0x568   : > { %v1860_v2 = vsel %vm842_vm11, %v799_v27, %v1805_v37 }
 0x569   : > { %1007 = vrot.lane.b32.xlu0 %v1860_v2, %s1598_s11 }
 0x5c8   : > { %v832_v16 = vpop.permute.xlu1 %831 }
 0x5c9   : > { %v834_v59 = vsel %vm829_vm10, %v832_v16, 0.0  ;;  %v1865_v60 = vsel %vm829_vm10, %v832_v16, %v1810_v40 }
 0x5ca   : > { %v835_v61 = vpack.c.bf16 %v834_v59, %v834_v59  ;;  %v861_v35 = vpack.c.bf16 %v1865_v60, %v1865_v60 }
 0x5cc   : > { %1454 = vst.msk [vmem:[%s1679_s23 + $0x2] sm:$0x3] %vm620_vm7, %v835_v61  ;;  %v845_v17 = vpop.permute.xlu0 %844  ;;  %1458 = vmatmul.mubr.msk.bf16.vlgmr.msra.gmra.mrb[8].mxu0 %vm409_vm1, %v861_v35 }
 0x5cd   : > { %v847_v37 = vsel %vm842_vm11, %v845_v17, 0.0  ;;  %v1873_v62 = vsel %vm842_vm11, %v845_v17, %v1818_v43  ;;  %1081 = vmatpush1.bf16.msra.mxu0 %v1703_v4  ;;  %1112 = vmatprep.mubr.bf16.mxu0 %v1597_v3  ;;  %v1889_v4 = vld [vmem:[%s1669_s16 + $0x8] sm:$0xff]   ;;  %s1035_s16 = sadd.s32 2, %s1657_s29 }
 0x5ce   : > { %v848_v40 = vpack.c.bf16 %v847_v37, %v847_v37  ;;  %v906_v63 = vpack.c.bf16 %v1873_v62, %v1873_v62  ;;  %1082 = vmatprep.subr.bf16.mxu0 %v1715_v6  ;;  %v857_v43 = vunpack.c.l.bf16 %v1889_v4  ;;  %v1036_v49 = vstv %s1035_s16 }
 0x5cf   : > { %vm1037_vm12 = vcmp.lt.s32.totalorder %v1036_v49, %v1785_v57 }
 0x5d0   : > { %1455 = vst.msk [vmem:[%s1684_s30 + $0x4] sm:$0x3] %vm620_vm7, %v848_v40  ;;  %1459 = vmatmul.mubr.msk.bf16.vlgmr.msra.gmra.mrb[8].mxu1 %vm409_vm1, %v906_v63  ;;  %v959_v34 = vrot.slane %v857_v43, 4  ;;  %v1502_v47 = vpack.i.bf16 %v860_v18, %v857_v43  ;;  %v1041_v54 = vsel %vm1037_vm12, 1, %v1597_v3 }
 0x5d1   : > { %1126 = vmatpush1.bf16.msra.mxu1 %v1708_v5  ;;  %1083 = vmatpush1.bf16.msra.mxu0 %v1728_v8 }
 0x5d2   : > { %1127 = vmatprep.subr.bf16.mxu1 %v1723_v7  ;;  %1157 = vmatprep.mubr.bf16.mxu1 %v1597_v3 }
 0x5d5   : > { %1128 = vmatpush1.bf16.msra.mxu1 %v1734_v9 }
 0x5d7   : > { %v966_v29 = vpop.permute.xlu1 %965 }
 0x5db   : > { %v1008_v32 = vpop.permute.xlu0 %1007 }
 0x69f   : > { %v899_v6 = vpop.f32.mrb[8].mxu0 }
 0x6a0   : > { %v951_v13 = vadd.f32 %v899_v6, %v857_v43  ;;  %v901_v14 = vpop.f32.mrb[9].mxu0 }
 0x6a1   : > { %v903_v5 = vpop.f32.mrb[10].mxu0  ;;  %v961_v36 = vadd.f32 %v959_v34, %v901_v14 }
 0x6a2   : > { %v1460_v19 = vmul.f32 -1.442695, %v951_v13  ;;  %v904_v8 = vpop.f32.mrb[11].mxu0 }
 0x6a3   : > { %v944_v20 = vpop.f32.mrb[8].mxu1 }
 0x6a4   : > { %1556 = vpow2.f32 %v1460_v19  ;;  %v993_v7 = vadd.f32 %v944_v20, %v860_v18  ;;  %v946_v21 = vpop.f32.mrb[9].mxu1 }
 0x6a5   : > { %v948_v22 = vpop.f32.mrb[10].mxu1  ;;  %v1003_v39 = vadd.f32 %v1001_v38, %v946_v21 }
 0x6a6   : > { %v1461_v9 = vmul.f32 -1.442695, %v993_v7  ;;  %v949_v23 = vpop.f32.mrb[11].mxu1 }
 0x6a8   : > { %1558 = vpow2.f32 %v1461_v9 }
 0x6ae   : > { %v1557_v24 = vpop.eup %1556 }
 0x6af   : > { %v955_v25 = vadd.f32 1.0, %v1557_v24 }
 0x6b1   : > { %1560 = vrcp.f32 %v955_v25 }
 0x6b2   : > { %v1559_v26 = vpop.eup %1558 }
 0x6b3   : > { %v997_v27 = vadd.f32 1.0, %v1559_v26 }
 0x6b5   : > { %1562 = vrcp.f32 %v997_v27 }
 0x6b6   : > { %1564 = vtanh.f32 %v961_v36 }
 0x6b7   : > { %1566 = vtanh.f32 %v1003_v39 }
 0x6bb   : > { %v1561_v28 = vpop.eup %1560 }
 0x6bc   : > { %v968_v30 = vmul.f32 %v1561_v28, %v966_v29  ;;  %v985_v37 = vsub.f32 1.0, %v1561_v28 }
 0x6be   : > { %970 = vrot.lane.b32.xlu1 %v968_v30, %s1599_s13 }
 0x6bf   : > { %v1563_v31 = vpop.eup %1562 }
 0x6c0   : > { %v1010_v33 = vmul.f32 %v1563_v31, %v1008_v32  ;;  %v1565_v12 = vpop.eup %1564  ;;  %v1027_v14 = vsub.f32 1.0, %v1563_v31 }
 0x6c1   : > { %v963_v41 = vmul.f32 %v1565_v12, %v1561_v28  ;;  %v1567_v44 = vpop.eup %1566 }
 0x6c2   : > { %1012 = vrot.lane.b32.xlu0 %v1010_v33, %s1599_s13  ;;  %v1005_v10 = vmul.f32 %v1567_v44, %v1563_v31  ;;  %v1075_v33 = vunpack.c.l.bf16 %v1893_v0 }
 0x6c4   : > { %v1216_v52 = vrot.slane %v1075_v33, 4 }
 0x730   : > { %v971_v15 = vpop.permute.xlu1 %970 }
 0x731   : > { %v973_v42 = vadd.f32 %v971_v15, %v963_v41 }
 0x733   : > { %1568 = vtanh.f32 %v973_v42 }
 0x734   : > { %v1013_v11 = vpop.permute.xlu0 %1012 }
 0x735   : > { %v1015_v45 = vadd.f32 %v1013_v11, %v1005_v10 }
 0x737   : > { %1570 = vtanh.f32 %v1015_v45 }
 0x73d   : > { %v1569_v46 = vpop.eup %1568 }
 0x73e   : > { %976 = vrot.lane.b32.xlu1 %v1569_v46, %s1600_s14 }
 0x741   : > { %v1571_v48 = vpop.eup %1570 }
 0x742   : > { %1018 = vrot.lane.b32.xlu0 %v1571_v48, %s1600_s14  ;;  %1503 = vrot.lane.b32.xlu1 %v1502_v47, %s1600_s14 }
 0x7b0   : > { %v977_v50 = vpop.permute.xlu1 %976 }
 0x7b1   : > { %v979_v51 = vmul.f32 %v1561_v28, %v977_v50 }
 0x7b3   : > { %981 = vrot.lane.b32.xlu0 %v979_v51, %s1598_s11 }
 0x7b4   : > { %v1019_v53 = vpop.permute.xlu0 %1018  ;;  %v1504_v58 = vpop.permute.xlu1 %1503 }
 0x7b5   : > { %v1021_v55 = vmul.f32 %v1563_v31, %v1019_v53  ;;  %v1505_v16 = vunpack.i.l.bf16 %v1504_v58  ;;  %v1506_v59 = vunpack.i.h.bf16 %v1504_v58 }
 0x7b7   : > { %1023 = vrot.lane.b32.xlu1 %v1021_v55, %s1598_s11  ;;  %1043 = vperm.xlu0 %1496, %v1041_v54   ;;  %v988_v61 = vrot.slane %v1505_v16, 4  ;;  %v1030_v35 = vrot.slane %v1506_v59, 4 }
 0x7b9   : > { %v989_v17 = vsel %vm557_vm4, %v1505_v16, %v988_v61  ;;  %v1031_v6 = vsel %vm557_vm4, %v1506_v59, %v1030_v35 }
 0x7ba   : > { %v991_v43 = vmul.f32 %v989_v17, %v985_v37  ;;  %v1033_v19 = vmul.f32 %v1031_v6, %v1027_v14 }
 0x7bb   : > { %1056 = vperm.xlu1 %1495, %v1054_v1  }
 0x825   : > { %v982_v40 = vpop.permute.xlu0 %981 }
 0x826   : > { %v984_v63 = vmul.f32 %v1561_v28, %v982_v40 }
 0x828   : > { %v992_v13 = vadd.f32 %v991_v43, %v984_v63  ;;  %v1251_v63 = vstv %s1250_s22 }
 0x829   : > { %v1024_v18 = vpop.permute.xlu1 %1023  ;;  %vm1252_vm0 = vcmp.lt.s32.totalorder %v1251_v63, %v1785_v57 }
 0x82a   : > { %v1026_v5 = vmul.f32 %v1563_v31, %v1024_v18  ;;  %1047 = vrot.lane.b32.xlu0 %v992_v13, %s1598_s11  ;;  %v1253_v13 = vstv %s1661_s9  ;;  %v1255_v18 = vsel %vm1252_vm0, 1, %v1597_v3 }
 0x82c   : > { %v1034_v8 = vadd.f32 %v1033_v19, %v1026_v5 }
 0x82e   : > { %1060 = vrot.lane.b32.xlu1 %v1034_v8, %s1598_s11 }
 0x836   : > { %v1044_v20 = vpop.permute.xlu0 %1043 }
 0x837   : > { %vm1045_vm14 = vcmp.eq.s32.totalorder %v1044_v20, 1 }
 0x838   : > { %v1914_v7 = vsel %vm1045_vm14, %v973_v42, %v1855_v56 }
 0x839   : > { %1180 = vrot.lane.b32.xlu0 %v1914_v7, %s1598_s11 }
 0x83a   : > { %v1057_v21 = vpop.permute.xlu1 %1056 }
 0x83b   : > { %vm1058_vm15 = vcmp.eq.s32.totalorder %v1057_v21, 1 }
 0x83c   : > { %v1919_v22 = vsel %vm1058_vm15, %v1015_v45, %v1860_v2 }
 0x83d   : > { %1222 = vrot.lane.b32.xlu1 %v1919_v22, %s1598_s11 }
 0x89c   : > { %v1048_v9 = vpop.permute.xlu0 %1047 }
 0x89d   : > { %v1050_v23 = vsel %vm1045_vm14, %v1048_v9, 0.0  ;;  %v1924_v24 = vsel %vm1045_vm14, %v1048_v9, %v1865_v60  ;;  %v1073_v60 = vunpack.c.h.bf16 %v1889_v4 }
 0x89e   : > { %v1051_v25 = vpack.c.bf16 %v1050_v23, %v1050_v23  ;;  %v1076_v56 = vpack.c.bf16 %v1924_v24, %v1924_v24 }
 0x89f   : > { %v1174_v50 = vrot.slane %v1073_v60, 4  ;;  %v1507_v37 = vpack.i.bf16 %v1075_v33, %v1073_v60 }
 0x8a0   : > { %1462 = vst.msk [vmem:[%s1679_s23 + $0x4] sm:$0x3] %vm620_vm7, %v1051_v25  ;;  %v1061_v26 = vpop.permute.xlu1 %1060  ;;  %1465 = vmatmul.mubr.msk.bf16.vlgmr.msra.gmra.mrb[12].mxu0 %vm409_vm1, %v1076_v56 }
 0x8a1   : > { %v1063_v27 = vsel %vm1058_vm15, %v1061_v26, 0.0  ;;  %v1932_v2 = vsel %vm1058_vm15, %v1061_v26, %v1873_v62 }
 0x8a2   : > { %v1064_v28 = vpack.c.bf16 %v1063_v27, %v1063_v27  ;;  %v1121_v29 = vpack.c.bf16 %v1932_v2, %v1932_v2 }
 0x8a4   : > { %1463 = vst.msk [vmem:[%s1684_s30 + $0x2] sm:$0x3] %vm620_vm7, %v1064_v28  ;;  %1466 = vmatmul.mubr.msk.bf16.vlgmr.msra.gmra.mrb[12].mxu1 %vm409_vm1, %v1121_v29  ;;  %vm1254_vm1 = vcmp.lt.s32.totalorder %v1253_v13, %v1785_v57 }
 0x8a5   : > { %v1268_v19 = vsel %vm1254_vm1, 1, %v1597_v3 }
 0x8ab   : > { %v1181_v46 = vpop.permute.xlu0 %1180 }
 0x8af   : > { %v1223_v48 = vpop.permute.xlu1 %1222 }
 0x973   : > { %v1114_v30 = vpop.f32.mrb[12].mxu0 }
 0x974   : > { %v1166_v31 = vadd.f32 %v1114_v30, %v1073_v60  ;;  %v1116_v32 = vpop.f32.mrb[13].mxu0 }
 0x975   : > { %v1118_v34 = vpop.f32.mrb[14].mxu0  ;;  %v1176_v51 = vadd.f32 %v1174_v50, %v1116_v32 }
 0x976   : > { %v1467_v36 = vmul.f32 -1.442695, %v1166_v31  ;;  %v1119_v38 = vpop.f32.mrb[15].mxu0 }
 0x977   : > { %v1159_v62 = vpop.f32.mrb[12].mxu1 }
 0x978   : > { %1572 = vpow2.f32 %v1467_v36  ;;  %v1208_v39 = vadd.f32 %v1159_v62, %v1075_v33  ;;  %v1161_v12 = vpop.f32.mrb[13].mxu1 }
 0x979   : > { %v1163_v41 = vpop.f32.mrb[14].mxu1  ;;  %v1218_v53 = vadd.f32 %v1216_v52, %v1161_v12 }
 0x97a   : > { %v1468_v15 = vmul.f32 -1.442695, %v1208_v39  ;;  %v1164_v42 = vpop.f32.mrb[15].mxu1 }
 0x97c   : > { %1574 = vpow2.f32 %v1468_v15 }
 0x982   : > { %v1573_v44 = vpop.eup %1572 }
 0x983   : > { %v1170_v10 = vadd.f32 1.0, %v1573_v44 }
 0x985   : > { %1576 = vrcp.f32 %v1170_v10 }
 0x986   : > { %v1575_v4 = vpop.eup %1574 }
 0x987   : > { %v1212_v11 = vadd.f32 1.0, %v1575_v4 }
 0x989   : > { %1578 = vrcp.f32 %v1212_v11 }
 0x98a   : > { %1580 = vtanh.f32 %v1176_v51 }
 0x98b   : > { %1582 = vtanh.f32 %v1218_v53 }
 0x98f   : > { %v1577_v45 = vpop.eup %1576 }
 0x990   : > { %v1183_v0 = vmul.f32 %v1577_v45, %v1181_v46  ;;  %v1200_v56 = vsub.f32 1.0, %v1577_v45 }
 0x992   : > { %1185 = vrot.lane.b32.xlu0 %v1183_v0, %s1599_s13 }
 0x993   : > { %v1579_v47 = vpop.eup %1578 }
 0x994   : > { %v1225_v49 = vmul.f32 %v1579_v47, %v1223_v48  ;;  %v1581_v54 = vpop.eup %1580  ;;  %v1242_v60 = vsub.f32 1.0, %v1579_v47 }
 0x995   : > { %v1178_v55 = vmul.f32 %v1581_v54, %v1577_v45  ;;  %v1583_v16 = vpop.eup %1582 }
 0x996   : > { %1227 = vrot.lane.b32.xlu1 %v1225_v49, %s1599_s13  ;;  %v1220_v59 = vmul.f32 %v1583_v16, %v1579_v47 }
 0xa04   : > { %v1186_v1 = vpop.permute.xlu0 %1185 }
 0xa05   : > { %v1188_v58 = vadd.f32 %v1186_v1, %v1178_v55 }
 0xa07   : > { %1584 = vtanh.f32 %v1188_v58 }
 0xa08   : > { %v1228_v61 = vpop.permute.xlu1 %1227 }
 0xa09   : > { %v1230_v35 = vadd.f32 %v1228_v61, %v1220_v59 }
 0xa0b   : > { %1586 = vtanh.f32 %v1230_v35 }
 0xa11   : > { %v1585_v17 = vpop.eup %1584 }
 0xa12   : > { %1191 = vrot.lane.b32.xlu0 %v1585_v17, %s1600_s14 }
 0xa15   : > { %v1587_v40 = vpop.eup %1586 }
 0xa16   : > { %1233 = vrot.lane.b32.xlu1 %v1587_v40, %s1600_s14  ;;  %1508 = vrot.lane.b32.xlu0 %v1507_v37, %s1600_s14 }
 0xa84   : > { %v1192_v43 = vpop.permute.xlu0 %1191 }
 0xa85   : > { %v1194_v6 = vmul.f32 %v1577_v45, %v1192_v43 }
 0xa87   : > { %1196 = vrot.lane.b32.xlu1 %v1194_v6, %s1598_s11 }
 0xa88   : > { %v1234_v14 = vpop.permute.xlu1 %1233  ;;  %v1509_v8 = vpop.permute.xlu0 %1508 }
 0xa89   : > { %v1236_v5 = vmul.f32 %v1579_v47, %v1234_v14  ;;  %v1510_v20 = vunpack.i.l.bf16 %v1509_v8  ;;  %v1511_v21 = vunpack.i.h.bf16 %v1509_v8 }
 0xa8b   : > { %1238 = vrot.lane.b32.xlu0 %v1236_v5, %s1598_s11  ;;  %1257 = vperm.xlu1 %1495, %v1255_v18   ;;  %v1203_v9 = vrot.slane %v1510_v20, 4  ;;  %v1245_v23 = vrot.slane %v1511_v21, 4 }
 0xa8d   : > { %v1204_v25 = vsel %vm557_vm4, %v1510_v20, %v1203_v9  ;;  %v1246_v29 = vsel %vm557_vm4, %v1511_v21, %v1245_v23 }
 0xa8e   : > { %v1206_v28 = vmul.f32 %v1204_v25, %v1200_v56  ;;  %v1248_v32 = vmul.f32 %v1246_v29, %v1242_v60 }
 0xa8f   : > { %1270 = vperm.xlu0 %1496, %v1268_v19  }
 0xaf9   : > { %v1197_v26 = vpop.permute.xlu1 %1196 }
 0xafa   : > { %v1199_v27 = vmul.f32 %v1577_v45, %v1197_v26 }
 0xafc   : > { %v1207_v57 = vadd.f32 %v1206_v28, %v1199_v27 }
 0xafd   : > { %v1239_v30 = vpop.permute.xlu0 %1238 }
 0xafe   : > { %v1241_v31 = vmul.f32 %v1579_v47, %v1239_v30  ;;  %1261 = vrot.lane.b32.xlu1 %v1207_v57, %s1598_s11 }
 0xb00   : > { %v1249_v3 = vadd.f32 %v1248_v32, %v1241_v31 }
 0xb02   : > { %1274 = vrot.lane.b32.xlu0 %v1249_v3, %s1598_s11 }
 0xb0a   : > { %v1258_v33 = vpop.permute.xlu1 %1257 }
 0xb0b   : > { %vm1259_vm3 = vcmp.eq.s32.totalorder %v1258_v33, 1 }
 0xb0c   : > { %v1281_v34 = vsel %vm1259_vm3, %v1188_v58, %v1914_v7 }
 0xb0d   : > { %1286 = vst.msk [vmem:[#allocation3] sm:$0xf] %vm1284_vm2, %v1281_v34  ;;  %1296 = vst.msk [vmem:[%s1998_s8] sm:$0xf] (!%p1470_p6), %vm1284_vm2, %v1281_v34 }
 0xb0e   : > { %v1271_v36 = vpop.permute.xlu0 %1270 }
 0xb0f   : > { %vm1272_vm4 = vcmp.eq.s32.totalorder %v1271_v36, 1 }
 0xb10   : > { %v1283_v38 = vsel %vm1272_vm4, %v1230_v35, %v1919_v22 }
 0xb11   : > { %1288 = vst.msk [vmem:[#allocation5] sm:$0xf] %vm1284_vm2, %v1283_v38  ;;  %1472 = vst.msk [vmem:[%s1998_s8 + $0x4] sm:$0xf] (!%p1470_p6), %vm1284_vm2, %v1283_v38 }
 0xb70   : > { %v1262_v62 = vpop.permute.xlu1 %1261 }
 0xb71   : > { %v1264_v39 = vsel %vm1259_vm3, %v1262_v62, 0.0  ;;  %v1280_v12 = vsel %vm1259_vm3, %v1262_v62, %v1924_v24 }
 0xb72   : > { %v1265_v41 = vpack.c.bf16 %v1264_v39, %v1264_v39  ;;  %1285 = vst.msk [vmem:[#allocation2] sm:$0xf] %vm1284_vm2, %v1280_v12  ;;  %1292 = sbr.rel (%p1470_p6) target bundleno = 2937 (0xb79), region = 48  ;;  %1293 = vst.msk [vmem:[%s1997_s7] sm:$0xf] (!%p1470_p6), %vm1284_vm2, %v1280_v12 }
 0xb74   : > { %1469 = vst.msk [vmem:[%s1679_s23 + $0x6] sm:$0x3] %vm620_vm7, %v1265_v41  ;;  %v1275_v15 = vpop.permute.xlu0 %1274 }
 0xb75   : > { %v1277_v7 = vsel %vm1272_vm4, %v1275_v15, 0.0  ;;  %v1282_v42 = vsel %vm1272_vm4, %v1275_v15, %v1932_v2 }
 0xb76   : > { %v1278_v44 = vpack.c.bf16 %v1277_v7, %v1277_v7  ;;  %1287 = vst.msk [vmem:[#allocation4] sm:$0xf] %vm1284_vm2, %v1282_v42  ;;  %1471 = vst.msk [vmem:[%s1997_s7 + $0x4] sm:$0xf] (!%p1470_p6), %vm1284_vm2, %v1282_v42 }
 0xb78   : > { %1279 = vst.msk [vmem:[%s1684_s30] sm:$0x3] %vm620_vm7, %v1278_v44 }
 0xb79 PF: > { %s19_s27 = sadd.s32 1, %s1594_s27  }
 0xb7a   : > { %p16_p7 = scmp.ge.s32.totalorder %s19_s27, 5  }
 0xb7c   :  { %18 = sbr.rel (!%p16_p7) target bundleno = 1 (0x1), region = 123 }

</bundles_post_ra>
